<compile_context>
chip_gen: v7x
topology: tpu7x:2x2x1
jax: 0.10.0
libtpu: 0.0.40
codegen_flags: <defaults>
</compile_context>

<pallas_src>
import numpy as np
import jax
import jax.numpy as jnp
from jax import lax
from jax.experimental import pallas as pl
from jax.experimental.pallas import tpu as pltpu

# ---- small, forward-consistent config ----
B  = 2            # batch
T  = 8            # n_tokens (<= ctx_width)
E  = 128          # n_embed
H  = 4            # n_heads
HD = E // H       # head dim
NH = E            # n_hidden (hidden_scale = 1.0, see NOTE above)
M  = B * T        # folded matmul M dimension
EPS = 1e-5        # nn.LayerNorm default eps

assert NH == E, "packed-param layout and residual add assume n_hidden == n_embed"


def _gelu_tanh(x):
    # tanh-approx GELU: one EUP tanh instead of the VALU-heavy erf rational.
    c = np.float32(np.sqrt(2.0 / np.pi))
    return 0.5 * x * (1.0 + jnp.tanh(c * (x + np.float32(0.044715) * x * x * x)))


def _layernorm(x, gamma, beta):
    mu = jnp.mean(x, axis=-1, keepdims=True)
    xc = x - mu
    var = jnp.mean(xc * xc, axis=-1, keepdims=True)
    return xc * lax.rsqrt(var + EPS) * gamma + beta


def transformer_block_kernel(x_ref, wl_ref, wp_ref, w0_ref, w1_ref, pp_ref,
                             o_ref, y_scr):
    # pp_ref rows: 0=ln0_g, 1=ln0_b, 2=b0, 3=b1, 4=ln1_g, 5=ln1_b
    # y_scr: (M, E) bf16 VMEM scratch holding concatenated per-head context.
    x = x_ref[...]                                   # (M, E) f32 (residual path)
    xb = x.astype(jnp.bfloat16)                      # MXU operand

    # ---------------- causal self attention ----------------
    qkv = jnp.dot(xb, wl_ref[...], preferred_element_type=jnp.float32)  # (M, 3E)
    q = qkv[:, 0:E]
    k = qkv[:, E:2 * E]
    v = qkv[:, 2 * E:3 * E]

    # per-batch (T, T) causal mask — no block-diagonal waste over folded M
    row = lax.broadcasted_iota(jnp.int32, (T, T), 0)
    col = lax.broadcasted_iota(jnp.int32, (T, T), 1)
    mask = row >= col
    neg = jnp.float32(-1e30)                         # finite, NaN-robust
    inv_sqrt_hd = np.float32(1.0 / np.sqrt(HD))

    for h in range(H):                               # static unroll over heads
        qh = q[:, h * HD:(h + 1) * HD]               # (M, HD)
        kh = k[:, h * HD:(h + 1) * HD]
        vh = v[:, h * HD:(h + 1) * HD]
        for b in range(B):                           # per-batch (T, T) attention
            qb = qh[b * T:(b + 1) * T, :]            # (T, HD) — sublane-aligned slice
            kb = kh[b * T:(b + 1) * T, :]
            vb = vh[b * T:(b + 1) * T, :]
            # contract last dims directly: no kb.T / XLU transpose
            s = lax.dot_general(qb, kb, (((1,), (1,)), ((), ())),
                                preferred_element_type=jnp.float32) * inv_sqrt_hd
            s = jnp.where(mask, s, neg)
            s = s - jnp.max(s, axis=-1, keepdims=True)
            p = jnp.exp(s)
            p = p * pl.reciprocal(jnp.sum(p, axis=-1, keepdims=True), approx=True)
            yb = jnp.dot(p, vb, preferred_element_type=jnp.float32)     # (T, HD)
            # drop the head output at its lane offset; projection happens once below
            y_scr[b * T:(b + 1) * T, h * HD:(h + 1) * HD] = yb.astype(jnp.bfloat16)

    # single output projection with full K = E contraction depth
    y = jnp.dot(y_scr[...], wp_ref[...], preferred_element_type=jnp.float32)  # (M, E)

    # residual + ln0
    x = x + y
    x = _layernorm(x, pp_ref[0:1, :], pp_ref[1:2, :])

    # ---------------- MLP ----------------
    hdn = jnp.dot(x.astype(jnp.bfloat16), w0_ref[...],
                  preferred_element_type=jnp.float32) + pp_ref[2:3, :]
    hdn = _gelu_tanh(hdn)
    m = jnp.dot(hdn.astype(jnp.bfloat16), w1_ref[...],
                preferred_element_type=jnp.float32) + pp_ref[3:4, :]

    # residual + ln1
    x = x + m
    x = _layernorm(x, pp_ref[4:5, :], pp_ref[5:6, :])

    o_ref[...] = x


def prepare_params(params):
    """One-time (init-side) prep: transpose to (in, out), cast MXU operands to
    bf16, pack the six 1-D vectors into a single (6, E) f32 block.  Keep the
    result and reuse it across calls — nothing here belongs on the hot path."""
    return {
        "wl": jnp.asarray(params["w_lift"].T, jnp.bfloat16),   # (E, 3E)
        "wp": jnp.asarray(params["w_proj"].T, jnp.bfloat16),   # (E, E)
        "w0": jnp.asarray(params["w0"].T, jnp.bfloat16),       # (E, NH)
        "w1": jnp.asarray(params["w1"].T, jnp.bfloat16),       # (NH, E)->(E, NH) with NH==E
        "pp": jnp.stack([params["ln0_g"], params["ln0_b"],
                         params["b0"], params["b1"],
                         params["ln1_g"], params["ln1_b"]], axis=0).astype(jnp.float32),
    }


@jax.jit
def transformer_block(x, prepped):
    x2d = x.reshape(M, E)                             # fold batch into M
    vmem = pl.BlockSpec(memory_space=pltpu.MemorySpace.VMEM)
    out = pl.pallas_call(
        transformer_block_kernel,
        out_shape=jax.ShapeDtypeStruct((M, E), jnp.float32),
        in_specs=[vmem] * 6,                          # whole arrays, no grid/pipeline
        out_specs=vmem,
        scratch_shapes=[pltpu.VMEM((M, E), jnp.bfloat16)],
    )(x2d, prepped["wl"], prepped["wp"], prepped["w0"], prepped["w1"], prepped["pp"])
    return out.reshape(B, T, E)


# ---------------- plain-JAX reference (for sanity check) ----------------
def transformer_block_ref(x, params):
    P = lax.Precision.HIGHEST

    def ln(z, g, b):
        mu = jnp.mean(z, -1, keepdims=True)
        zc = z - mu
        var = jnp.mean(zc * zc, -1, keepdims=True)
        return zc / jnp.sqrt(var + EPS) * g + b

    qkv = jnp.einsum("bte,fe->btf", x, params["w_lift"], precision=P)
    q, k, v = jnp.split(qkv, 3, axis=-1)
    q = q.reshape(B, T, H, HD).transpose(0, 2, 1, 3)
    k = k.reshape(B, T, H, HD).transpose(0, 2, 1, 3)
    v = v.reshape(B, T, H, HD).transpose(0, 2, 1, 3)
    a = jnp.einsum("bhqd,bhkd->bhqk", q, k, precision=P) / np.float32(np.sqrt(HD))
    mask = np.tril(np.ones((T, T), dtype=bool))
    a = jnp.where(mask, a, -jnp.inf)
    a = jax.nn.softmax(a, axis=-1)
    y = jnp.einsum("bhqk,bhkd->bhqd", a, v, precision=P)
    y = y.transpose(0, 2, 1, 3).reshape(B, T, E)
    y = jnp.einsum("bte,fe->btf", y, params["w_proj"], precision=P)
    x = ln(x + y, params["ln0_g"], params["ln0_b"])
    h0 = jnp.einsum("bte,fe->btf", x, params["w0"], precision=P) + params["b0"]
    h0 = 0.5 * h0 * (1.0 + lax.erf(h0 / np.float32(np.sqrt(2.0))))   # exact GELU
    m = jnp.einsum("bte,fe->btf", h0, params["w1"], precision=P) + params["b1"]
    x = ln(x + m, params["ln1_g"], params["ln1_b"])
    return x


def init_params(key):
    ks = jax.random.split(key, 8)
    s = 0.02
    return {
        "w_lift": jax.random.normal(ks[0], (3 * E, E), jnp.float32) * s,
        "w_proj": jax.random.normal(ks[1], (E, E), jnp.float32) * s,
        "w0":     jax.random.normal(ks[2], (NH, E), jnp.float32) * s,
        "b0":     jax.random.normal(ks[3], (NH,), jnp.float32) * s,
        "w1":     jax.random.normal(ks[4], (NH, E), jnp.float32) * s,
        "b1":     jax.random.normal(ks[5], (NH,), jnp.float32) * s,
        "ln0_g":  jnp.ones((E,), jnp.float32),
        "ln0_b":  jnp.zeros((E,), jnp.float32),
        "ln1_g":  jnp.ones((E,), jnp.float32)
                  + 0.1 * jax.random.normal(ks[6], (E,), jnp.float32),
        "ln1_b":  0.1 * jax.random.normal(ks[7], (E,), jnp.float32),
    }


if __name__ == "__main__":
    key = jax.random.PRNGKey(0)
    pkey, xkey = jax.random.split(key)
    params = init_params(pkey)
    x = jax.random.normal(xkey, (B, T, E), jnp.float32)

    prepped = jax.tree_util.tree_map(jax.block_until_ready, prepare_params(params))

    out = transformer_block(x, prepped)
    out = jax.block_until_ready(out)

    ref = transformer_block_ref(x, params)
    np.testing.assert_allclose(np.asarray(out), np.asarray(ref), rtol=2e-2, atol=2e-2)
    assert bool(jnp.isfinite(out).all())
    print("KERNEL_OK")
</pallas_src>

<mosaic_0001>
module attributes {stable_mosaic.version = 11 : i64} {
  func.func @transformer_block_kernel(%arg0: memref<16x128xf32, #tpu.memory_space<vmem>>, %arg1: memref<128x384xbf16, #tpu.memory_space<vmem>>, %arg2: memref<128x128xbf16, #tpu.memory_space<vmem>>, %arg3: memref<128x128xbf16, #tpu.memory_space<vmem>>, %arg4: memref<128x128xbf16, #tpu.memory_space<vmem>>, %arg5: memref<6x128xf32, #tpu.memory_space<vmem>>, %arg6: memref<16x128xf32, #tpu.memory_space<vmem>>, %arg7: memref<16x128xbf16, #tpu.memory_space<vmem>>) attributes {dimension_semantics = [], scalar_prefetch = 0 : i64, scratch_operands = 1 : i64, tpu.core_type = #tpu.core_type<tc>} {
    %c0 = arith.constant 0 : index
    %c0_0 = arith.constant 0 : index
    %0 = vector.load %arg0[%c0, %c0_0] : memref<16x128xf32, #tpu.memory_space<vmem>>, vector<16x128xf32>
    %1 = arith.truncf %0 : vector<16x128xf32> to vector<16x128xbf16>
    %c0_1 = arith.constant 0 : index
    %c0_2 = arith.constant 0 : index
    %2 = vector.load %arg1[%c0_1, %c0_2] : memref<128x384xbf16, #tpu.memory_space<vmem>>, vector<128x384xbf16>
    %cst = arith.constant dense<0.000000e+00> : vector<16x384xf32>
    %3 = tpu.matmul %1, %2, %cst {dimension_numbers = #tpu.dot_dimension_numbers<[1], [0], [0], [1], [0, 0, 1, 1], [], []>} : vector<16x128xbf16>, vector<128x384xbf16>, vector<16x384xf32> -> vector<16x384xf32>
    %4 = vector.extract_strided_slice %3 {offsets = [0, 0], sizes = [16, 128], strides = [1, 1]} : vector<16x384xf32> to vector<16x128xf32>
    %5 = vector.extract_strided_slice %3 {offsets = [0, 128], sizes = [16, 128], strides = [1, 1]} : vector<16x384xf32> to vector<16x128xf32>
    %6 = vector.extract_strided_slice %3 {offsets = [0, 256], sizes = [16, 128], strides = [1, 1]} : vector<16x384xf32> to vector<16x128xf32>
    %7 = tpu.iota {dimensions = array<i32: 0>} : vector<8x8xi32>
    %8 = tpu.iota {dimensions = array<i32: 1>} : vector<8x8xi32>
    %9 = arith.cmpi sge, %7, %8 : vector<8x8xi32>
    %10 = vector.extract_strided_slice %4 {offsets = [0, 0], sizes = [16, 32], strides = [1, 1]} : vector<16x128xf32> to vector<16x32xf32>
    %11 = vector.extract_strided_slice %5 {offsets = [0, 0], sizes = [16, 32], strides = [1, 1]} : vector<16x128xf32> to vector<16x32xf32>
    %12 = vector.extract_strided_slice %6 {offsets = [0, 0], sizes = [16, 32], strides = [1, 1]} : vector<16x128xf32> to vector<16x32xf32>
    %13 = vector.extract_strided_slice %10 {offsets = [0, 0], sizes = [8, 32], strides = [1, 1]} : vector<16x32xf32> to vector<8x32xf32>
    %14 = vector.extract_strided_slice %11 {offsets = [0, 0], sizes = [8, 32], strides = [1, 1]} : vector<16x32xf32> to vector<8x32xf32>
    %15 = vector.extract_strided_slice %12 {offsets = [0, 0], sizes = [8, 32], strides = [1, 1]} : vector<16x32xf32> to vector<8x32xf32>
    %cst_3 = arith.constant dense<0.000000e+00> : vector<8x8xf32>
    %16 = tpu.matmul %13, %14, %cst_3 {dimension_numbers = #tpu.dot_dimension_numbers<[1], [1], [0], [0], [0, 0, 1, 0], [], []>} : vector<8x32xf32>, vector<8x32xf32>, vector<8x8xf32> -> vector<8x8xf32>
    %cst_4 = arith.constant 0.176776692 : f32
    %17 = vector.broadcast %cst_4 : f32 to vector<8x8xf32>
    %18 = arith.mulf %16, %17 : vector<8x8xf32>
    %cst_5 = arith.constant -1.000000e+30 : f32
    %19 = vector.broadcast %cst_5 : f32 to vector<8x8xf32>
    %20 = arith.select %9, %18, %19 : vector<8x8xi1>, vector<8x8xf32>
    %cst_6 = arith.constant dense<0xFF800000> : vector<8xf32>
    %21 = vector.multi_reduction <maximumf>, %20, %cst_6 [1] : vector<8x8xf32> to vector<8xf32>
    %22 = vector.shape_cast %21 : vector<8xf32> to vector<8x1xf32>
    %23 = vector.broadcast %22 : vector<8x1xf32> to vector<8x8xf32>
    %24 = arith.subf %20, %23 : vector<8x8xf32>
    %25 = math.exp %24 : vector<8x8xf32>
    %cst_7 = arith.constant dense<0.000000e+00> : vector<8xf32>
    %26 = vector.multi_reduction <add>, %25, %cst_7 [1] : vector<8x8xf32> to vector<8xf32>
    %27 = vector.shape_cast %26 : vector<8xf32> to vector<8x1xf32>
    %28 = tpu.reciprocal %27 {approx = true} : vector<8x1xf32> -> vector<8x1xf32>
    %29 = vector.broadcast %28 : vector<8x1xf32> to vector<8x8xf32>
    %30 = arith.mulf %25, %29 : vector<8x8xf32>
    %cst_8 = arith.constant dense<0.000000e+00> : vector<8x32xf32>
    %31 = tpu.matmul %30, %15, %cst_8 {dimension_numbers = #tpu.dot_dimension_numbers<[1], [0], [0], [1], [0, 0, 1, 1], [], []>} : vector<8x8xf32>, vector<8x32xf32>, vector<8x32xf32> -> vector<8x32xf32>
    %32 = arith.truncf %31 : vector<8x32xf32> to vector<8x32xbf16>
    %c0_9 = arith.constant 0 : index
    %c0_10 = arith.constant 0 : index
    %33 = vector.load %arg7[%c0_9, %c0_10] : memref<16x128xbf16, #tpu.memory_space<vmem>>, vector<8x32xbf16>
    tpu.vector_store %arg7[%c0_9, %c0_10], %32 {strides = array<i32>} : memref<16x128xbf16, #tpu.memory_space<vmem>>, vector<8x32xbf16>,
    %34 = vector.extract_strided_slice %10 {offsets = [8, 0], sizes = [8, 32], strides = [1, 1]} : vector<16x32xf32> to vector<8x32xf32>
    %35 = vector.extract_strided_slice %11 {offsets = [8, 0], sizes = [8, 32], strides = [1, 1]} : vector<16x32xf32> to vector<8x32xf32>
    %36 = vector.extract_strided_slice %12 {offsets = [8, 0], sizes = [8, 32], strides = [1, 1]} : vector<16x32xf32> to vector<8x32xf32>
    %cst_11 = arith.constant dense<0.000000e+00> : vector<8x8xf32>
    %37 = tpu.matmul %34, %35, %cst_11 {dimension_numbers = #tpu.dot_dimension_numbers<[1], [1], [0], [0], [0, 0, 1, 0], [], []>} : vector<8x32xf32>, vector<8x32xf32>, vector<8x8xf32> -> vector<8x8xf32>
    %cst_12 = arith.constant 0.176776692 : f32
    %38 = vector.broadcast %cst_12 : f32 to vector<8x8xf32>
    %39 = arith.mulf %37, %38 : vector<8x8xf32>
    %cst_13 = arith.constant -1.000000e+30 : f32
    %40 = vector.broadcast %cst_13 : f32 to vector<8x8xf32>
    %41 = arith.select %9, %39, %40 : vector<8x8xi1>, vector<8x8xf32>
    %cst_14 = arith.constant dense<0xFF800000> : vector<8xf32>
    %42 = vector.multi_reduction <maximumf>, %41, %cst_14 [1] : vector<8x8xf32> to vector<8xf32>
    %43 = vector.shape_cast %42 : vector<8xf32> to vector<8x1xf32>
    %44 = vector.broadcast %43 : vector<8x1xf32> to vector<8x8xf32>
    %45 = arith.subf %41, %44 : vector<8x8xf32>
    %46 = math.exp %45 : vector<8x8xf32>
    %cst_15 = arith.constant dense<0.000000e+00> : vector<8xf32>
    %47 = vector.multi_reduction <add>, %46, %cst_15 [1] : vector<8x8xf32> to vector<8xf32>
    %48 = vector.shape_cast %47 : vector<8xf32> to vector<8x1xf32>
    %49 = tpu.reciprocal %48 {approx = true} : vector<8x1xf32> -> vector<8x1xf32>
    %50 = vector.broadcast %49 : vector<8x1xf32> to vector<8x8xf32>
    %51 = arith.mulf %46, %50 : vector<8x8xf32>
    %cst_16 = arith.constant dense<0.000000e+00> : vector<8x32xf32>
    %52 = tpu.matmul %51, %36, %cst_16 {dimension_numbers = #tpu.dot_dimension_numbers<[1], [0], [0], [1], [0, 0, 1, 1], [], []>} : vector<8x8xf32>, vector<8x32xf32>, vector<8x32xf32> -> vector<8x32xf32>
    %53 = arith.truncf %52 : vector<8x32xf32> to vector<8x32xbf16>
    %c8 = arith.constant 8 : index
    %c0_17 = arith.constant 0 : index
    %54 = vector.load %arg7[%c8, %c0_17] : memref<16x128xbf16, #tpu.memory_space<vmem>>, vector<8x32xbf16>
    tpu.vector_store %arg7[%c8, %c0_17], %53 {strides = array<i32>} : memref<16x128xbf16, #tpu.memory_space<vmem>>, vector<8x32xbf16>,
    %55 = vector.extract_strided_slice %4 {offsets = [0, 32], sizes = [16, 32], strides = [1, 1]} : vector<16x128xf32> to vector<16x32xf32>
    %56 = vector.extract_strided_slice %5 {offsets = [0, 32], sizes = [16, 32], strides = [1, 1]} : vector<16x128xf32> to vector<16x32xf32>
    %57 = vector.extract_strided_slice %6 {offsets = [0, 32], sizes = [16, 32], strides = [1, 1]} : vector<16x128xf32> to vector<16x32xf32>
    %58 = vector.extract_strided_slice %55 {offsets = [0, 0], sizes = [8, 32], strides = [1, 1]} : vector<16x32xf32> to vector<8x32xf32>
    %59 = vector.extract_strided_slice %56 {offsets = [0, 0], sizes = [8, 32], strides = [1, 1]} : vector<16x32xf32> to vector<8x32xf32>
    %60 = vector.extract_strided_slice %57 {offsets = [0, 0], sizes = [8, 32], strides = [1, 1]} : vector<16x32xf32> to vector<8x32xf32>
    %cst_18 = arith.constant dense<0.000000e+00> : vector<8x8xf32>
    %61 = tpu.matmul %58, %59, %cst_18 {dimension_numbers = #tpu.dot_dimension_numbers<[1], [1], [0], [0], [0, 0, 1, 0], [], []>} : vector<8x32xf32>, vector<8x32xf32>, vector<8x8xf32> -> vector<8x8xf32>
    %cst_19 = arith.constant 0.176776692 : f32
    %62 = vector.broadcast %cst_19 : f32 to vector<8x8xf32>
    %63 = arith.mulf %61, %62 : vector<8x8xf32>
    %cst_20 = arith.constant -1.000000e+30 : f32
    %64 = vector.broadcast %cst_20 : f32 to vector<8x8xf32>
    %65 = arith.select %9, %63, %64 : vector<8x8xi1>, vector<8x8xf32>
    %cst_21 = arith.constant dense<0xFF800000> : vector<8xf32>
    %66 = vector.multi_reduction <maximumf>, %65, %cst_21 [1] : vector<8x8xf32> to vector<8xf32>
    %67 = vector.shape_cast %66 : vector<8xf32> to vector<8x1xf32>
    %68 = vector.broadcast %67 : vector<8x1xf32> to vector<8x8xf32>
    %69 = arith.subf %65, %68 : vector<8x8xf32>
    %70 = math.exp %69 : vector<8x8xf32>
    %cst_22 = arith.constant dense<0.000000e+00> : vector<8xf32>
    %71 = vector.multi_reduction <add>, %70, %cst_22 [1] : vector<8x8xf32> to vector<8xf32>
    %72 = vector.shape_cast %71 : vector<8xf32> to vector<8x1xf32>
    %73 = tpu.reciprocal %72 {approx = true} : vector<8x1xf32> -> vector<8x1xf32>
    %74 = vector.broadcast %73 : vector<8x1xf32> to vector<8x8xf32>
    %75 = arith.mulf %70, %74 : vector<8x8xf32>
    %cst_23 = arith.constant dense<0.000000e+00> : vector<8x32xf32>
    %76 = tpu.matmul %75, %60, %cst_23 {dimension_numbers = #tpu.dot_dimension_numbers<[1], [0], [0], [1], [0, 0, 1, 1], [], []>} : vector<8x8xf32>, vector<8x32xf32>, vector<8x32xf32> -> vector<8x32xf32>
    %77 = arith.truncf %76 : vector<8x32xf32> to vector<8x32xbf16>
    %c0_24 = arith.constant 0 : index
    %c32 = arith.constant 32 : index
    %78 = vector.load %arg7[%c0_24, %c32] : memref<16x128xbf16, #tpu.memory_space<vmem>>, vector<8x32xbf16>
    tpu.vector_store %arg7[%c0_24, %c32], %77 {strides = array<i32>} : memref<16x128xbf16, #tpu.memory_space<vmem>>, vector<8x32xbf16>,
    %79 = vector.extract_strided_slice %55 {offsets = [8, 0], sizes = [8, 32], strides = [1, 1]} : vector<16x32xf32> to vector<8x32xf32>
    %80 = vector.extract_strided_slice %56 {offsets = [8, 0], sizes = [8, 32], strides = [1, 1]} : vector<16x32xf32> to vector<8x32xf32>
    %81 = vector.extract_strided_slice %57 {offsets = [8, 0], sizes = [8, 32], strides = [1, 1]} : vector<16x32xf32> to vector<8x32xf32>
    %cst_25 = arith.constant dense<0.000000e+00> : vector<8x8xf32>
    %82 = tpu.matmul %79, %80, %cst_25 {dimension_numbers = #tpu.dot_dimension_numbers<[1], [1], [0], [0], [0, 0, 1, 0], [], []>} : vector<8x32xf32>, vector<8x32xf32>, vector<8x8xf32> -> vector<8x8xf32>
    %cst_26 = arith.constant 0.176776692 : f32
    %83 = vector.broadcast %cst_26 : f32 to vector<8x8xf32>
    %84 = arith.mulf %82, %83 : vector<8x8xf32>
    %cst_27 = arith.constant -1.000000e+30 : f32
    %85 = vector.broadcast %cst_27 : f32 to vector<8x8xf32>
    %86 = arith.select %9, %84, %85 : vector<8x8xi1>, vector<8x8xf32>
    %cst_28 = arith.constant dense<0xFF800000> : vector<8xf32>
    %87 = vector.multi_reduction <maximumf>, %86, %cst_28 [1] : vector<8x8xf32> to vector<8xf32>
    %88 = vector.shape_cast %87 : vector<8xf32> to vector<8x1xf32>
    %89 = vector.broadcast %88 : vector<8x1xf32> to vector<8x8xf32>
    %90 = arith.subf %86, %89 : vector<8x8xf32>
    %91 = math.exp %90 : vector<8x8xf32>
    %cst_29 = arith.constant dense<0.000000e+00> : vector<8xf32>
    %92 = vector.multi_reduction <add>, %91, %cst_29 [1] : vector<8x8xf32> to vector<8xf32>
    %93 = vector.shape_cast %92 : vector<8xf32> to vector<8x1xf32>
    %94 = tpu.reciprocal %93 {approx = true} : vector<8x1xf32> -> vector<8x1xf32>
    %95 = vector.broadcast %94 : vector<8x1xf32> to vector<8x8xf32>
    %96 = arith.mulf %91, %95 : vector<8x8xf32>
    %cst_30 = arith.constant dense<0.000000e+00> : vector<8x32xf32>
    %97 = tpu.matmul %96, %81, %cst_30 {dimension_numbers = #tpu.dot_dimension_numbers<[1], [0], [0], [1], [0, 0, 1, 1], [], []>} : vector<8x8xf32>, vector<8x32xf32>, vector<8x32xf32> -> vector<8x32xf32>
    %98 = arith.truncf %97 : vector<8x32xf32> to vector<8x32xbf16>
    %c8_31 = arith.constant 8 : index
    %c32_32 = arith.constant 32 : index
    %99 = vector.load %arg7[%c8_31, %c32_32] : memref<16x128xbf16, #tpu.memory_space<vmem>>, vector<8x32xbf16>
    tpu.vector_store %arg7[%c8_31, %c32_32], %98 {strides = array<i32>} : memref<16x128xbf16, #tpu.memory_space<vmem>>, vector<8x32xbf16>,
    %100 = vector.extract_strided_slice %4 {offsets = [0, 64], sizes = [16, 32], strides = [1, 1]} : vector<16x128xf32> to vector<16x32xf32>
    %101 = vector.extract_strided_slice %5 {offsets = [0, 64], sizes = [16, 32], strides = [1, 1]} : vector<16x128xf32> to vector<16x32xf32>
    %102 = vector.extract_strided_slice %6 {offsets = [0, 64], sizes = [16, 32], strides = [1, 1]} : vector<16x128xf32> to vector<16x32xf32>
    %103 = vector.extract_strided_slice %100 {offsets = [0, 0], sizes = [8, 32], strides = [1, 1]} : vector<16x32xf32> to vector<8x32xf32>
    %104 = vector.extract_strided_slice %101 {offsets = [0, 0], sizes = [8, 32], strides = [1, 1]} : vector<16x32xf32> to vector<8x32xf32>
    %105 = vector.extract_strided_slice %102 {offsets = [0, 0], sizes = [8, 32], strides = [1, 1]} : vector<16x32xf32> to vector<8x32xf32>
    %cst_33 = arith.constant dense<0.000000e+00> : vector<8x8xf32>
    %106 = tpu.matmul %103, %104, %cst_33 {dimension_numbers = #tpu.dot_dimension_numbers<[1], [1], [0], [0], [0, 0, 1, 0], [], []>} : vector<8x32xf32>, vector<8x32xf32>, vector<8x8xf32> -> vector<8x8xf32>
    %cst_34 = arith.constant 0.176776692 : f32
    %107 = vector.broadcast %cst_34 : f32 to vector<8x8xf32>
    %108 = arith.mulf %106, %107 : vector<8x8xf32>
    %cst_35 = arith.constant -1.000000e+30 : f32
    %109 = vector.broadcast %cst_35 : f32 to vector<8x8xf32>
    %110 = arith.select %9, %108, %109 : vector<8x8xi1>, vector<8x8xf32>
    %cst_36 = arith.constant dense<0xFF800000> : vector<8xf32>
    %111 = vector.multi_reduction <maximumf>, %110, %cst_36 [1] : vector<8x8xf32> to vector<8xf32>
    %112 = vector.shape_cast %111 : vector<8xf32> to vector<8x1xf32>
    %113 = vector.broadcast %112 : vector<8x1xf32> to vector<8x8xf32>
    %114 = arith.subf %110, %113 : vector<8x8xf32>
    %115 = math.exp %114 : vector<8x8xf32>
    %cst_37 = arith.constant dense<0.000000e+00> : vector<8xf32>
    %116 = vector.multi_reduction <add>, %115, %cst_37 [1] : vector<8x8xf32> to vector<8xf32>
    %117 = vector.shape_cast %116 : vector<8xf32> to vector<8x1xf32>
    %118 = tpu.reciprocal %117 {approx = true} : vector<8x1xf32> -> vector<8x1xf32>
    %119 = vector.broadcast %118 : vector<8x1xf32> to vector<8x8xf32>
    %120 = arith.mulf %115, %119 : vector<8x8xf32>
    %cst_38 = arith.constant dense<0.000000e+00> : vector<8x32xf32>
    %121 = tpu.matmul %120, %105, %cst_38 {dimension_numbers = #tpu.dot_dimension_numbers<[1], [0], [0], [1], [0, 0, 1, 1], [], []>} : vector<8x8xf32>, vector<8x32xf32>, vector<8x32xf32> -> vector<8x32xf32>
    %122 = arith.truncf %121 : vector<8x32xf32> to vector<8x32xbf16>
    %c0_39 = arith.constant 0 : index
    %c64 = arith.constant 64 : index
    %123 = vector.load %arg7[%c0_39, %c64] : memref<16x128xbf16, #tpu.memory_space<vmem>>, vector<8x32xbf16>
    tpu.vector_store %arg7[%c0_39, %c64], %122 {strides = array<i32>} : memref<16x128xbf16, #tpu.memory_space<vmem>>, vector<8x32xbf16>,
    %124 = vector.extract_strided_slice %100 {offsets = [8, 0], sizes = [8, 32], strides = [1, 1]} : vector<16x32xf32> to vector<8x32xf32>
    %125 = vector.extract_strided_slice %101 {offsets = [8, 0], sizes = [8, 32], strides = [1, 1]} : vector<16x32xf32> to vector<8x32xf32>
    %126 = vector.extract_strided_slice %102 {offsets = [8, 0], sizes = [8, 32], strides = [1, 1]} : vector<16x32xf32> to vector<8x32xf32>
    %cst_40 = arith.constant dense<0.000000e+00> : vector<8x8xf32>
    %127 = tpu.matmul %124, %125, %cst_40 {dimension_numbers = #tpu.dot_dimension_numbers<[1], [1], [0], [0], [0, 0, 1, 0], [], []>} : vector<8x32xf32>, vector<8x32xf32>, vector<8x8xf32> -> vector<8x8xf32>
    %cst_41 = arith.constant 0.176776692 : f32
    %128 = vector.broadcast %cst_41 : f32 to vector<8x8xf32>
    %129 = arith.mulf %127, %128 : vector<8x8xf32>
    %cst_42 = arith.constant -1.000000e+30 : f32
    %130 = vector.broadcast %cst_42 : f32 to vector<8x8xf32>
    %131 = arith.select %9, %129, %130 : vector<8x8xi1>, vector<8x8xf32>
    %cst_43 = arith.constant dense<0xFF800000> : vector<8xf32>
    %132 = vector.multi_reduction <maximumf>, %131, %cst_43 [1] : vector<8x8xf32> to vector<8xf32>
    %133 = vector.shape_cast %132 : vector<8xf32> to vector<8x1xf32>
    %134 = vector.broadcast %133 : vector<8x1xf32> to vector<8x8xf32>
    %135 = arith.subf %131, %134 : vector<8x8xf32>
    %136 = math.exp %135 : vector<8x8xf32>
    %cst_44 = arith.constant dense<0.000000e+00> : vector<8xf32>
    %137 = vector.multi_reduction <add>, %136, %cst_44 [1] : vector<8x8xf32> to vector<8xf32>
    %138 = vector.shape_cast %137 : vector<8xf32> to vector<8x1xf32>
    %139 = tpu.reciprocal %138 {approx = true} : vector<8x1xf32> -> vector<8x1xf32>
    %140 = vector.broadcast %139 : vector<8x1xf32> to vector<8x8xf32>
    %141 = arith.mulf %136, %140 : vector<8x8xf32>
    %cst_45 = arith.constant dense<0.000000e+00> : vector<8x32xf32>
    %142 = tpu.matmul %141, %126, %cst_45 {dimension_numbers = #tpu.dot_dimension_numbers<[1], [0], [0], [1], [0, 0, 1, 1], [], []>} : vector<8x8xf32>, vector<8x32xf32>, vector<8x32xf32> -> vector<8x32xf32>
    %143 = arith.truncf %142 : vector<8x32xf32> to vector<8x32xbf16>
    %c8_46 = arith.constant 8 : index
    %c64_47 = arith.constant 64 : index
    %144 = vector.load %arg7[%c8_46, %c64_47] : memref<16x128xbf16, #tpu.memory_space<vmem>>, vector<8x32xbf16>
    tpu.vector_store %arg7[%c8_46, %c64_47], %143 {strides = array<i32>} : memref<16x128xbf16, #tpu.memory_space<vmem>>, vector<8x32xbf16>,
    %145 = vector.extract_strided_slice %4 {offsets = [0, 96], sizes = [16, 32], strides = [1, 1]} : vector<16x128xf32> to vector<16x32xf32>
    %146 = vector.extract_strided_slice %5 {offsets = [0, 96], sizes = [16, 32], strides = [1, 1]} : vector<16x128xf32> to vector<16x32xf32>
    %147 = vector.extract_strided_slice %6 {offsets = [0, 96], sizes = [16, 32], strides = [1, 1]} : vector<16x128xf32> to vector<16x32xf32>
    %148 = vector.extract_strided_slice %145 {offsets = [0, 0], sizes = [8, 32], strides = [1, 1]} : vector<16x32xf32> to vector<8x32xf32>
    %149 = vector.extract_strided_slice %146 {offsets = [0, 0], sizes = [8, 32], strides = [1, 1]} : vector<16x32xf32> to vector<8x32xf32>
    %150 = vector.extract_strided_slice %147 {offsets = [0, 0], sizes = [8, 32], strides = [1, 1]} : vector<16x32xf32> to vector<8x32xf32>
    %cst_48 = arith.constant dense<0.000000e+00> : vector<8x8xf32>
    %151 = tpu.matmul %148, %149, %cst_48 {dimension_numbers = #tpu.dot_dimension_numbers<[1], [1], [0], [0], [0, 0, 1, 0], [], []>} : vector<8x32xf32>, vector<8x32xf32>, vector<8x8xf32> -> vector<8x8xf32>
    %cst_49 = arith.constant 0.176776692 : f32
    %152 = vector.broadcast %cst_49 : f32 to vector<8x8xf32>
    %153 = arith.mulf %151, %152 : vector<8x8xf32>
    %cst_50 = arith.constant -1.000000e+30 : f32
    %154 = vector.broadcast %cst_50 : f32 to vector<8x8xf32>
    %155 = arith.select %9, %153, %154 : vector<8x8xi1>, vector<8x8xf32>
    %cst_51 = arith.constant dense<0xFF800000> : vector<8xf32>
    %156 = vector.multi_reduction <maximumf>, %155, %cst_51 [1] : vector<8x8xf32> to vector<8xf32>
    %157 = vector.shape_cast %156 : vector<8xf32> to vector<8x1xf32>
    %158 = vector.broadcast %157 : vector<8x1xf32> to vector<8x8xf32>
    %159 = arith.subf %155, %158 : vector<8x8xf32>
    %160 = math.exp %159 : vector<8x8xf32>
    %cst_52 = arith.constant dense<0.000000e+00> : vector<8xf32>
    %161 = vector.multi_reduction <add>, %160, %cst_52 [1] : vector<8x8xf32> to vector<8xf32>
    %162 = vector.shape_cast %161 : vector<8xf32> to vector<8x1xf32>
    %163 = tpu.reciprocal %162 {approx = true} : vector<8x1xf32> -> vector<8x1xf32>
    %164 = vector.broadcast %163 : vector<8x1xf32> to vector<8x8xf32>
    %165 = arith.mulf %160, %164 : vector<8x8xf32>
    %cst_53 = arith.constant dense<0.000000e+00> : vector<8x32xf32>
    %166 = tpu.matmul %165, %150, %cst_53 {dimension_numbers = #tpu.dot_dimension_numbers<[1], [0], [0], [1], [0, 0, 1, 1], [], []>} : vector<8x8xf32>, vector<8x32xf32>, vector<8x32xf32> -> vector<8x32xf32>
    %167 = arith.truncf %166 : vector<8x32xf32> to vector<8x32xbf16>
    %c0_54 = arith.constant 0 : index
    %c96 = arith.constant 96 : index
    %168 = vector.load %arg7[%c0_54, %c96] : memref<16x128xbf16, #tpu.memory_space<vmem>>, vector<8x32xbf16>
    tpu.vector_store %arg7[%c0_54, %c96], %167 {strides = array<i32>} : memref<16x128xbf16, #tpu.memory_space<vmem>>, vector<8x32xbf16>,
    %169 = vector.extract_strided_slice %145 {offsets = [8, 0], sizes = [8, 32], strides = [1, 1]} : vector<16x32xf32> to vector<8x32xf32>
    %170 = vector.extract_strided_slice %146 {offsets = [8, 0], sizes = [8, 32], strides = [1, 1]} : vector<16x32xf32> to vector<8x32xf32>
    %171 = vector.extract_strided_slice %147 {offsets = [8, 0], sizes = [8, 32], strides = [1, 1]} : vector<16x32xf32> to vector<8x32xf32>
    %cst_55 = arith.constant dense<0.000000e+00> : vector<8x8xf32>
    %172 = tpu.matmul %169, %170, %cst_55 {dimension_numbers = #tpu.dot_dimension_numbers<[1], [1], [0], [0], [0, 0, 1, 0], [], []>} : vector<8x32xf32>, vector<8x32xf32>, vector<8x8xf32> -> vector<8x8xf32>
    %cst_56 = arith.constant 0.176776692 : f32
    %173 = vector.broadcast %cst_56 : f32 to vector<8x8xf32>
    %174 = arith.mulf %172, %173 : vector<8x8xf32>
    %cst_57 = arith.constant -1.000000e+30 : f32
    %175 = vector.broadcast %cst_57 : f32 to vector<8x8xf32>
    %176 = arith.select %9, %174, %175 : vector<8x8xi1>, vector<8x8xf32>
    %cst_58 = arith.constant dense<0xFF800000> : vector<8xf32>
    %177 = vector.multi_reduction <maximumf>, %176, %cst_58 [1] : vector<8x8xf32> to vector<8xf32>
    %178 = vector.shape_cast %177 : vector<8xf32> to vector<8x1xf32>
    %179 = vector.broadcast %178 : vector<8x1xf32> to vector<8x8xf32>
    %180 = arith.subf %176, %179 : vector<8x8xf32>
    %181 = math.exp %180 : vector<8x8xf32>
    %cst_59 = arith.constant dense<0.000000e+00> : vector<8xf32>
    %182 = vector.multi_reduction <add>, %181, %cst_59 [1] : vector<8x8xf32> to vector<8xf32>
    %183 = vector.shape_cast %182 : vector<8xf32> to vector<8x1xf32>
    %184 = tpu.reciprocal %183 {approx = true} : vector<8x1xf32> -> vector<8x1xf32>
    %185 = vector.broadcast %184 : vector<8x1xf32> to vector<8x8xf32>
    %186 = arith.mulf %181, %185 : vector<8x8xf32>
    %cst_60 = arith.constant dense<0.000000e+00> : vector<8x32xf32>
    %187 = tpu.matmul %186, %171, %cst_60 {dimension_numbers = #tpu.dot_dimension_numbers<[1], [0], [0], [1], [0, 0, 1, 1], [], []>} : vector<8x8xf32>, vector<8x32xf32>, vector<8x32xf32> -> vector<8x32xf32>
    %188 = arith.truncf %187 : vector<8x32xf32> to vector<8x32xbf16>
    %c8_61 = arith.constant 8 : index
    %c96_62 = arith.constant 96 : index
    %189 = vector.load %arg7[%c8_61, %c96_62] : memref<16x128xbf16, #tpu.memory_space<vmem>>, vector<8x32xbf16>
    tpu.vector_store %arg7[%c8_61, %c96_62], %188 {strides = array<i32>} : memref<16x128xbf16, #tpu.memory_space<vmem>>, vector<8x32xbf16>,
    %c0_63 = arith.constant 0 : index
    %c0_64 = arith.constant 0 : index
    %190 = vector.load %arg7[%c0_63, %c0_64] : memref<16x128xbf16, #tpu.memory_space<vmem>>, vector<16x128xbf16>
    %c0_65 = arith.constant 0 : index
    %c0_66 = arith.constant 0 : index
    %191 = vector.load %arg2[%c0_65, %c0_66] : memref<128x128xbf16, #tpu.memory_space<vmem>>, vector<128x128xbf16>
    %cst_67 = arith.constant dense<0.000000e+00> : vector<16x128xf32>
    %192 = tpu.matmul %190, %191, %cst_67 {dimension_numbers = #tpu.dot_dimension_numbers<[1], [0], [0], [1], [0, 0, 1, 1], [], []>} : vector<16x128xbf16>, vector<128x128xbf16>, vector<16x128xf32> -> vector<16x128xf32>
    %193 = arith.addf %0, %192 : vector<16x128xf32>
    %c0_68 = arith.constant 0 : index
    %c0_69 = arith.constant 0 : index
    %194 = vector.load %arg5[%c0_68, %c0_69] : memref<6x128xf32, #tpu.memory_space<vmem>>, vector<1x128xf32>
    %c1 = arith.constant 1 : index
    %c0_70 = arith.constant 0 : index
    %195 = vector.load %arg5[%c1, %c0_70] : memref<6x128xf32, #tpu.memory_space<vmem>>, vector<1x128xf32>
    %cst_71 = arith.constant dense<0.000000e+00> : vector<16xf32>
    %196 = vector.multi_reduction <add>, %193, %cst_71 [1] : vector<16x128xf32> to vector<16xf32>
    %197 = vector.shape_cast %196 : vector<16xf32> to vector<16x1xf32>
    %cst_72 = arith.constant 1.280000e+02 : f32
    %198 = vector.broadcast %cst_72 : f32 to vector<16x1xf32>
    %199 = arith.divf %197, %198 : vector<16x1xf32>
    %200 = vector.broadcast %199 : vector<16x1xf32> to vector<16x128xf32>
    %201 = arith.subf %193, %200 : vector<16x128xf32>
    %202 = arith.mulf %201, %201 : vector<16x128xf32>
    %cst_73 = arith.constant dense<0.000000e+00> : vector<16xf32>
    %203 = vector.multi_reduction <add>, %202, %cst_73 [1] : vector<16x128xf32> to vector<16xf32>
    %204 = vector.shape_cast %203 : vector<16xf32> to vector<16x1xf32>
    %cst_74 = arith.constant 1.280000e+02 : f32
    %205 = vector.broadcast %cst_74 : f32 to vector<16x1xf32>
    %206 = arith.divf %204, %205 : vector<16x1xf32>
    %cst_75 = arith.constant 9.99999974E-6 : f32
    %207 = vector.broadcast %cst_75 : f32 to vector<16x1xf32>
    %208 = arith.addf %206, %207 : vector<16x1xf32>
    %209 = math.rsqrt %208 : vector<16x1xf32>
    %210 = vector.broadcast %209 : vector<16x1xf32> to vector<16x128xf32>
    %211 = arith.mulf %201, %210 : vector<16x128xf32>
    %212 = vector.broadcast %194 : vector<1x128xf32> to vector<16x128xf32>
    %213 = arith.mulf %211, %212 : vector<16x128xf32>
    %214 = vector.broadcast %195 : vector<1x128xf32> to vector<16x128xf32>
    %215 = arith.addf %213, %214 : vector<16x128xf32>
    %216 = arith.truncf %215 : vector<16x128xf32> to vector<16x128xbf16>
    %c0_76 = arith.constant 0 : index
    %c0_77 = arith.constant 0 : index
    %217 = vector.load %arg3[%c0_76, %c0_77] : memref<128x128xbf16, #tpu.memory_space<vmem>>, vector<128x128xbf16>
    %cst_78 = arith.constant dense<0.000000e+00> : vector<16x128xf32>
    %218 = tpu.matmul %216, %217, %cst_78 {dimension_numbers = #tpu.dot_dimension_numbers<[1], [0], [0], [1], [0, 0, 1, 1], [], []>} : vector<16x128xbf16>, vector<128x128xbf16>, vector<16x128xf32> -> vector<16x128xf32>
    %c2 = arith.constant 2 : index
    %c0_79 = arith.constant 0 : index
    %219 = vector.load %arg5[%c2, %c0_79] : memref<6x128xf32, #tpu.memory_space<vmem>>, vector<1x128xf32>
    %220 = vector.broadcast %219 : vector<1x128xf32> to vector<16x128xf32>
    %221 = arith.addf %218, %220 : vector<16x128xf32>
    %cst_80 = arith.constant 5.000000e-01 : f32
    %222 = vector.broadcast %cst_80 : f32 to vector<16x128xf32>
    %223 = arith.mulf %222, %221 : vector<16x128xf32>
    %cst_81 = arith.constant 4.471500e-02 : f32
    %224 = vector.broadcast %cst_81 : f32 to vector<16x128xf32>
    %225 = arith.mulf %224, %221 : vector<16x128xf32>
    %226 = arith.mulf %225, %221 : vector<16x128xf32>
    %227 = arith.mulf %226, %221 : vector<16x128xf32>
    %228 = arith.addf %221, %227 : vector<16x128xf32>
    %cst_82 = arith.constant 0.797884583 : f32
    %229 = vector.broadcast %cst_82 : f32 to vector<16x128xf32>
    %230 = arith.mulf %229, %228 : vector<16x128xf32>
    %231 = math.tanh %230 : vector<16x128xf32>
    %cst_83 = arith.constant 1.000000e+00 : f32
    %232 = vector.broadcast %cst_83 : f32 to vector<16x128xf32>
    %233 = arith.addf %232, %231 : vector<16x128xf32>
    %234 = arith.mulf %223, %233 : vector<16x128xf32>
    %235 = arith.truncf %234 : vector<16x128xf32> to vector<16x128xbf16>
    %c0_84 = arith.constant 0 : index
    %c0_85 = arith.constant 0 : index
    %236 = vector.load %arg4[%c0_84, %c0_85] : memref<128x128xbf16, #tpu.memory_space<vmem>>, vector<128x128xbf16>
    %cst_86 = arith.constant dense<0.000000e+00> : vector<16x128xf32>
    %237 = tpu.matmul %235, %236, %cst_86 {dimension_numbers = #tpu.dot_dimension_numbers<[1], [0], [0], [1], [0, 0, 1, 1], [], []>} : vector<16x128xbf16>, vector<128x128xbf16>, vector<16x128xf32> -> vector<16x128xf32>
    %c3 = arith.constant 3 : index
    %c0_87 = arith.constant 0 : index
    %238 = vector.load %arg5[%c3, %c0_87] : memref<6x128xf32, #tpu.memory_space<vmem>>, vector<1x128xf32>
    %239 = vector.broadcast %238 : vector<1x128xf32> to vector<16x128xf32>
    %240 = arith.addf %237, %239 : vector<16x128xf32>
    %241 = arith.addf %215, %240 : vector<16x128xf32>
    %c4 = arith.constant 4 : index
    %c0_88 = arith.constant 0 : index
    %242 = vector.load %arg5[%c4, %c0_88] : memref<6x128xf32, #tpu.memory_space<vmem>>, vector<1x128xf32>
    %c5 = arith.constant 5 : index
    %c0_89 = arith.constant 0 : index
    %243 = vector.load %arg5[%c5, %c0_89] : memref<6x128xf32, #tpu.memory_space<vmem>>, vector<1x128xf32>
    %cst_90 = arith.constant dense<0.000000e+00> : vector<16xf32>
    %244 = vector.multi_reduction <add>, %241, %cst_90 [1] : vector<16x128xf32> to vector<16xf32>
    %245 = vector.shape_cast %244 : vector<16xf32> to vector<16x1xf32>
    %cst_91 = arith.constant 1.280000e+02 : f32
    %246 = vector.broadcast %cst_91 : f32 to vector<16x1xf32>
    %247 = arith.divf %245, %246 : vector<16x1xf32>
    %248 = vector.broadcast %247 : vector<16x1xf32> to vector<16x128xf32>
    %249 = arith.subf %241, %248 : vector<16x128xf32>
    %250 = arith.mulf %249, %249 : vector<16x128xf32>
    %cst_92 = arith.constant dense<0.000000e+00> : vector<16xf32>
    %251 = vector.multi_reduction <add>, %250, %cst_92 [1] : vector<16x128xf32> to vector<16xf32>
    %252 = vector.shape_cast %251 : vector<16xf32> to vector<16x1xf32>
    %cst_93 = arith.constant 1.280000e+02 : f32
    %253 = vector.broadcast %cst_93 : f32 to vector<16x1xf32>
    %254 = arith.divf %252, %253 : vector<16x1xf32>
    %cst_94 = arith.constant 9.99999974E-6 : f32
    %255 = vector.broadcast %cst_94 : f32 to vector<16x1xf32>
    %256 = arith.addf %254, %255 : vector<16x1xf32>
    %257 = math.rsqrt %256 : vector<16x1xf32>
    %258 = vector.broadcast %257 : vector<16x1xf32> to vector<16x128xf32>
    %259 = arith.mulf %249, %258 : vector<16x128xf32>
    %260 = vector.broadcast %242 : vector<1x128xf32> to vector<16x128xf32>
    %261 = arith.mulf %259, %260 : vector<16x128xf32>
    %262 = vector.broadcast %243 : vector<1x128xf32> to vector<16x128xf32>
    %263 = arith.addf %261, %262 : vector<16x128xf32>
    %c0_95 = arith.constant 0 : index
    %c0_96 = arith.constant 0 : index
    %264 = vector.load %arg6[%c0_95, %c0_96] : memref<16x128xf32, #tpu.memory_space<vmem>>, vector<16x128xf32>
    tpu.vector_store %arg6[%c0_95, %c0_96], %263 {strides = array<i32>} : memref<16x128xf32, #tpu.memory_space<vmem>>, vector<16x128xf32>,
    return
  }
}

</mosaic_0001>

<bundles_post_ra>
// kernel: transformer_block.1
= control target key start
LH: loop header
LB: loop body
LE: loop exit
PB: predicated region body
PF: predicated region fallthrough
CT: control target
= control target key end

     0   :  { %11 = vsyncpa [#allocation4], 0  ;;  %s3154_s0 = inlined_call_operand.hbm [shape: f32[16,128], index: 0, kind: input, shape index: {}]   ;;  %s3155_s1 = inlined_call_operand.hbm [shape: bf16[128,384], index: 1, kind: input, shape index: {}]   ;;  %s3156_s2 = inlined_call_operand.hbm [shape: bf16[128,128], index: 2, kind: input, shape index: {}]   ;;  %s3157_s3 = inlined_call_operand.hbm [shape: bf16[128,128], index: 3, kind: input, shape index: {}]   ;;  %s3158_s4 = inlined_call_operand.hbm [shape: bf16[128,128], index: 4, kind: input, shape index: {}]   ;;  %s3159_s5 = inlined_call_operand.hbm [shape: f32[6,128], index: 5, kind: input, shape index: {}]   ;;  %s3160_s6 = inlined_call_operand.hbm [shape: f32[16,128], index: 6, kind: output, shape index: {}]  }
   0x1   :  { %12 = vsyncpa [#allocation7], 0 }
   0x2   :  { %13 = vsyncpa [#allocation10], 0 }
   0x3   :  { %14 = vsyncpa [#allocation13], 0 }
   0x4   :  { %15 = vsyncpa [#allocation5], 0  ;;  %s2774_s21 = smov [#allocation6]   ;;  %s2610_s25 = scalar_lea.hbm %s3155_s1, 3072 }
   0x5   :  { %s33_s22 = sshll.u32 %s2774_s21, 4  ;;  %p2611_p0 = scmp.ne.s32.totalorder %s3155_s1, %s2610_s25  ;;  %s34_s22 = int_to_ptr.vmem [resolvable:$true] %s33_s22 }
   0x6   :  { %p2614_p1 = scmp.lt.u32.totalorder %s2610_s25, %s3155_s1 }
   0x8   :  { %p2616_p2 = pnand %p2614_p1, %p2611_p0 }
   0xa   :  { %2619 = shalt.err (!%p2616_p2)
}
   0xb   :  { %s2620_s30 = scalar_lea.vmem %s34_s22, 3072  ;;  %p2625_p4 = scmp.lt.s32.totalorder %s34_s22, %s34_s22 }
   0xc   :  { %p2621_p3 = scmp.ne.s32.totalorder %s34_s22, %s2620_s30  ;;  %p2626_p5 = scmp.lt.s32.totalorder %s2620_s30, %s2620_s30 }
   0xe   :  { %p2627_p6 = por %p2626_p5, %p2625_p4 }
  0x10   :  { %p2628_p7 = pnand %p2627_p6, %p2621_p3 }
  0x12   :  { %2631 = shalt.err (!%p2628_p7)
}
  0x13   :  { %s2775_s7 = smov 192   ;;  %s2776_s8 = smov 12  }
  0x14   :  { %39 = dma.hbm_to_vmem [thread:$0]  %s3155_s1, 3072, %s34_s22, [#allocation7], %s2775_s7, %s2775_s7, %s2776_s8  }
  0x15   :  { %s2777_s11 = smov [#allocation9]   ;;  %s2778_s13 = smov [#allocation3]  }
  0x16   :  { %s57_s12 = sshll.u32 %s2777_s11, 4  ;;  %s21_s14 = sshll.u32 %s2778_s13, 4  ;;  %s58_s12 = int_to_ptr.vmem [resolvable:$true] %s57_s12  ;;  %s22_s14 = int_to_ptr.vmem [resolvable:$true] %s21_s14 }
  0x17   :  { %s2632_s17 = scalar_lea.hbm %s3157_s3, 1024 }
  0x18   :  { %p2633_p8 = scmp.ne.s32.totalorder %s3157_s3, %s2632_s17  ;;  %p2636_p9 = scmp.lt.u32.totalorder %s2632_s17, %s3157_s3 }
  0x1a   :  { %p2638_p10 = pnand %p2636_p9, %p2633_p8 }
  0x1c   :  { %2641 = shalt.err (!%p2638_p10)
}
  0x1d   :  { %s2642_s1 = scalar_lea.vmem %s58_s12, 1024  ;;  %p2647_p12 = scmp.lt.s32.totalorder %s58_s12, %s58_s12 }
  0x1e   :  { %p2643_p11 = scmp.ne.s32.totalorder %s58_s12, %s2642_s1  ;;  %p2648_p13 = scmp.lt.s32.totalorder %s2642_s1, %s2642_s1 }
  0x20   :  { %p2649_p0 = por %p2648_p13, %p2647_p12 }
  0x22   :  { %p2650_p1 = pnand %p2649_p0, %p2643_p11 }
  0x24   :  { %2653 = shalt.err (!%p2650_p1)
}
  0x25   :  { %s2779_s22 = smov 64   ;;  %s2780_s23 = smov 4  }
  0x26   :  { %63 = dma.hbm_to_vmem [thread:$0]  %s3157_s3, 1024, %s58_s12, [#allocation10], %s2779_s22, %s2779_s22, %s2780_s23  }
  0x27   :  { %s2654_s28 = scalar_lea.hbm %s3154_s0, 256 }
  0x28   :  { %p2655_p2 = scmp.ne.s32.totalorder %s3154_s0, %s2654_s28  ;;  %p2658_p3 = scmp.lt.u32.totalorder %s2654_s28, %s3154_s0 }
  0x2a   :  { %p2660_p4 = pnand %p2658_p3, %p2655_p2 }
  0x2c   :  { %2663 = shalt.err (!%p2660_p4)
}
  0x2d   :  { %s2664_s9 = scalar_lea.vmem %s22_s14, 256  ;;  %p2669_p6 = scmp.lt.s32.totalorder %s22_s14, %s22_s14 }
  0x2e   :  { %p2665_p5 = scmp.ne.s32.totalorder %s22_s14, %s2664_s9  ;;  %p2670_p7 = scmp.lt.s32.totalorder %s2664_s9, %s2664_s9 }
  0x30   :  { %p2671_p8 = por %p2670_p7, %p2669_p6 }
  0x32   :  { %p2672_p9 = pnand %p2671_p8, %p2665_p5 }
  0x34   :  { %2675 = shalt.err (!%p2672_p9)
}
  0x35   :  { %s2781_s3 = smov 128   ;;  %s2782_s10 = smov 8  }
  0x36   :  { %27 = dma.hbm_to_vmem [thread:$0]  %s3154_s0, 256, %s22_s14, [#allocation4], %s2781_s3, %s2781_s3, %s2782_s10  }
  0x37   :  { %s2783_s13 = smov [#allocation8]   ;;  %s2784_s16 = smov [#allocation11]  }
  0x38   :  { %s45_s15 = sshll.u32 %s2783_s13, 4  ;;  %s69_s17 = sshll.u32 %s2784_s16, 4  ;;  %s46_s15 = int_to_ptr.vmem [resolvable:$true] %s45_s15  ;;  %s70_s17 = int_to_ptr.vmem [resolvable:$true] %s69_s17 }
  0x39   :  { %s2676_s20 = scalar_lea.hbm %s3156_s2, 1024 }
  0x3a   :  { %p2677_p10 = scmp.ne.s32.totalorder %s3156_s2, %s2676_s20  ;;  %p2680_p11 = scmp.lt.u32.totalorder %s2676_s20, %s3156_s2 }
  0x3c   :  { %p2682_p12 = pnand %p2680_p11, %p2677_p10 }
  0x3e   :  { %2685 = shalt.err (!%p2682_p12)
}
  0x3f   :  { %s2686_s0 = scalar_lea.vmem %s46_s15, 1024  ;;  %p2691_p0 = scmp.lt.s32.totalorder %s46_s15, %s46_s15 }
  0x40   :  { %p2687_p13 = scmp.ne.s32.totalorder %s46_s15, %s2686_s0  ;;  %p2692_p1 = scmp.lt.s32.totalorder %s2686_s0, %s2686_s0 }
  0x42   :  { %p2693_p2 = por %p2692_p1, %p2691_p0 }
  0x44   :  { %p2694_p3 = pnand %p2693_p2, %p2687_p13 }
  0x46   :  { %2697 = shalt.err (!%p2694_p3)
}
  0x47   :  { %51 = dma.hbm_to_vmem [thread:$0]  %s3156_s2, 1024, %s46_s15, [#allocation7], %s2779_s22, %s2779_s22, %s2780_s23  }
  0x48   :  { %s2698_s29 = scalar_lea.hbm %s3158_s4, 1024 }
  0x49   :  { %p2699_p4 = scmp.ne.s32.totalorder %s3158_s4, %s2698_s29  ;;  %p2702_p5 = scmp.lt.u32.totalorder %s2698_s29, %s3158_s4 }
  0x4b   :  { %p2704_p6 = pnand %p2702_p5, %p2699_p4 }
  0x4d   :  { %2707 = shalt.err (!%p2704_p6)
}
  0x4e   :  { %s2708_s11 = scalar_lea.vmem %s70_s17, 1024  ;;  %p2713_p8 = scmp.lt.s32.totalorder %s70_s17, %s70_s17 }
  0x4f   :  { %p2709_p7 = scmp.ne.s32.totalorder %s70_s17, %s2708_s11  ;;  %p2714_p9 = scmp.lt.s32.totalorder %s2708_s11, %s2708_s11 }
  0x51   :  { %p2715_p10 = por %p2714_p9, %p2713_p8 }
  0x53   :  { %p2716_p11 = pnand %p2715_p10, %p2709_p7 }
  0x55   :  { %2719 = shalt.err (!%p2716_p11)
}
  0x56   :  { %75 = dma.hbm_to_vmem [thread:$0]  %s3158_s4, 1024, %s70_s17, [#allocation10], %s2779_s22, %s2779_s22, %s2780_s23  }
  0x57   :  { %s2785_s13 = smov [#allocation12]   ;;  %s2720_s19 = scalar_lea.hbm %s3159_s5, 128 }
  0x58   :  { %s82_s15 = sshll.u32 %s2785_s13, 4  ;;  %p2721_p12 = scmp.ne.s32.totalorder %s3159_s5, %s2720_s19  ;;  %s83_s15 = int_to_ptr.vmem [resolvable:$true] %s82_s15 }
  0x59   :  { %p2724_p13 = scmp.lt.u32.totalorder %s2720_s19, %s3159_s5 }
  0x5b   :  { %p2726_p0 = pnand %p2724_p13, %p2721_p12 }
  0x5d   :  { %2729 = shalt.err (!%p2726_p0)
}
  0x5e   :  { %s2730_s25 = scalar_lea.vmem %s83_s15, 128  ;;  %p2735_p2 = scmp.lt.s32.totalorder %s83_s15, %s83_s15 }
  0x5f   :  { %p2731_p1 = scmp.ne.s32.totalorder %s83_s15, %s2730_s25  ;;  %p2736_p3 = scmp.lt.s32.totalorder %s2730_s25, %s2730_s25 }
  0x61   :  { %p2737_p4 = por %p2736_p3, %p2735_p2 }
  0x63   :  { %p2738_p5 = pnand %p2737_p4, %p2731_p1 }
  0x65   :  { %2741 = shalt.err (!%p2738_p5)
}
  0x66   :  { %85 = dma.hbm_to_vmem [thread:$0]  %s3159_s5, 128, %s83_s15, [#allocation13]  }
  0x67   :  { %2764 = dma.done.wait [#allocation4], 256  }
  0x68   :  { %2765 = vsyncadd [#allocation4], 4294967040 }
  0x69   :  { %2766 = dma.done.wait [#allocation7], 4096  }
  0x6a   :  { %2767 = vsyncadd [#allocation7], 4294963200 }
  0x6b   :  { %2768 = dma.done.wait [#allocation10], 2048  }
  0x6c   :  { %2769 = vsyncadd [#allocation10], 4294965248 }
  0x6d   :  { %2770 = dma.done.wait [#allocation13], 128  }
  0x6e   :  { %2771 = vsyncadd [#allocation13], 4294967168  ;;  %v2786_v0 = vmov 0   ;;  %v2787_v1 = vmov 0.0   ;;  %vm2788_vm0 = vmmov 0   ;;  %v2917_v23 = vld [vmem:[#allocation3] sm:$0xff]  ;;  %v352_v37 = vlaneseq }
  0x6f   :  { %300 = vmatprep.mubr.bf16.mxu0 %v2786_v0  ;;  %2332 = vmatprep.subr.bf16.mxu1 %v2787_v1  ;;  %v2510_v2 = vld [vmem:[#allocation6 + $0x4] ss:$12 sps:$4 sm:$0xff]   ;;  %v2512_v3 = vld [vmem:[#allocation6] ss:$12 sps:$4 sm:$0xff]   ;;  %v2513_v4 = vld [vmem:[#allocation6 + $0x1c] ss:$12 sps:$4 sm:$0xff]  }
  0x70   :  { %2348 = vmatprep.mubr.msk.bf16.mxu1 %vm2788_vm0, %v2787_v1  ;;  %268 = vmatprep.subr.bf16.mxu0 %v2510_v2  ;;  %v2515_v5 = vld [vmem:[#allocation6 + $0x18] ss:$12 sps:$4 sm:$0xff]   ;;  %v2516_v6 = vld [vmem:[#allocation6 + $0x34] ss:$12 sps:$4 sm:$0xff]   ;;  %v2518_v7 = vld [vmem:[#allocation6 + $0x30] ss:$12 sps:$4 sm:$0xff]  }
  0x71   :  { %269 = vmatpush1.bf16.msra.mxu0 %v2512_v3  ;;  %v2519_v8 = vld [vmem:[#allocation6 + $0x4c] ss:$12 sps:$4 sm:$0xff]   ;;  %v2521_v9 = vld [vmem:[#allocation6 + $0x48] ss:$12 sps:$4 sm:$0xff]   ;;  %v2522_v10 = vld [vmem:[#allocation6 + $0x64] ss:$12 sps:$4 sm:$0xff]  }
  0x72   :  { %270 = vmatprep.subr.bf16.mxu0 %v2513_v4  ;;  %v2534_v11 = vld [vmem:[#allocation6 + $0x8] ss:$12 sps:$4 sm:$0xff]   ;;  %v2535_v12 = vld [vmem:[#allocation6 + $0x20] ss:$12 sps:$4 sm:$0xff]   ;;  %v2527_v15 = vld [vmem:[#allocation6 + $0x78] ss:$12 sps:$4 sm:$0xff]  }
  0x73   :  { %2333 = vmatpush3.bf16.msra.mxu1 %v2534_v11  ;;  %v2524_v13 = vld [vmem:[#allocation6 + $0x60] ss:$12 sps:$4 sm:$0xff]   ;;  %v2525_v14 = vld [vmem:[#allocation6 + $0x7c] ss:$12 sps:$4 sm:$0xff]   ;;  %v2536_v16 = vld [vmem:[#allocation6 + $0x38] ss:$12 sps:$4 sm:$0xff]  }
  0x74   :  { %2334 = vmatprep.subr.bf16.mxu1 %v2787_v1  ;;  %v2528_v17 = vld [vmem:[#allocation6 + $0x94] ss:$12 sps:$4 sm:$0xff]   ;;  %v2537_v18 = vld [vmem:[#allocation6 + $0x50] ss:$12 sps:$4 sm:$0xff]   ;;  %v2531_v20 = vld [vmem:[#allocation6 + $0xac] ss:$12 sps:$4 sm:$0xff]  }
  0x75   :  { %271 = vmatpush1.bf16.msra.mxu0 %v2515_v5  ;;  %v2530_v19 = vld [vmem:[#allocation6 + $0x90] ss:$12 sps:$4 sm:$0xff]   ;;  %v2538_v21 = vld [vmem:[#allocation6 + $0x68] ss:$12 sps:$4 sm:$0xff]   ;;  %v2539_v25 = vld [vmem:[#allocation6 + $0x80] ss:$12 sps:$4 sm:$0xff]  }
  0x76   :  { %272 = vmatprep.subr.bf16.mxu0 %v2516_v6  ;;  %v2533_v22 = vld [vmem:[#allocation6 + $0xa8] ss:$12 sps:$4 sm:$0xff]   ;;  %v2919_v24 = vld [vmem:[#allocation3 + $0x8] sm:$0xff]  ;;  %vm357_vm1 = vcmask 261120   ;;  %v353_v38 = vshrl.u32 %v352_v37, 7  ;;  %v355_v39 = vand.u32 127, %v352_v37 }
  0x77   :  { %2335 = vmatpush3.bf16.msra.mxu1 %v2535_v12  ;;  %v107_v26 = vpack.c.bf16 %v2919_v24, %v2917_v23  ;;  %v2540_v27 = vld [vmem:[#allocation6 + $0x98] ss:$12 sps:$4 sm:$0xff]   ;;  %v2541_v28 = vld [vmem:[#allocation6 + $0xb0] ss:$12 sps:$4 sm:$0xff]   ;;  %vm436_vm3 = vcmask 64512   ;;  %s2789_s5 = smov 96  }
  0x78   :  { %2336 = vmatprep.subr.bf16.mxu1 %v2787_v1  ;;  %vm2954_vm2 = vcmp.ge.s32.totalorder %v353_v38, %v355_v39  ;;  %vm522_vm4 = vcmask 257024   ;;  %vm690_vm5 = vcmask 261124   ;;  %s2790_s17 = smov 32   ;;  %vm865_vm6 = vcmask 519424  }
  0x79   :  { %273 = vmatpush1.bf16.msra.mxu0 %v2518_v7  ;;  %vm1041_vm7 = vcmask 523524   ;;  %vm1215_vm8 = vcmask 781824   ;;  %vm1390_vm9 = vcmask 785924   ;;  %vm1564_vm10 = vcmask 1044224  }
  0x7a   :  { %274 = vmatprep.subr.bf16.mxu0 %v2519_v8  ;;  %vm1739_vm11 = vcmask 1048324  }
  0x7b   :  { %2337 = vmatpush3.bf16.msra.mxu1 %v2536_v16 }
  0x7c   :  { %2338 = vmatprep.subr.bf16.mxu1 %v2787_v1 }
  0x7d   :  { %275 = vmatpush1.bf16.msra.mxu0 %v2521_v9 }
  0x7e   :  { %276 = vmatprep.subr.bf16.mxu0 %v2522_v10 }
  0x7f   :  { %2339 = vmatpush3.bf16.msra.mxu1 %v2537_v18 }
  0x80   :  { %2340 = vmatprep.subr.bf16.mxu1 %v2787_v1 }
  0x81   :  { %277 = vmatpush1.bf16.msra.mxu0 %v2524_v13 }
  0x82   :  { %278 = vmatprep.subr.bf16.mxu0 %v2525_v14 }
  0x83   :  { %2341 = vmatpush3.bf16.msra.mxu1 %v2538_v21 }
  0x84   :  { %2342 = vmatprep.subr.bf16.mxu1 %v2787_v1 }
  0x85   :  { %279 = vmatpush1.bf16.msra.mxu0 %v2527_v15 }
  0x86   :  { %280 = vmatprep.subr.bf16.mxu0 %v2528_v17 }
  0x87   :  { %2343 = vmatpush3.bf16.msra.mxu1 %v2539_v25 }
  0x88   :  { %2344 = vmatprep.subr.bf16.mxu1 %v2787_v1 }
  0x89   :  { %281 = vmatpush1.bf16.msra.mxu0 %v2530_v19 }
  0x8a   :  { %282 = vmatprep.subr.bf16.mxu0 %v2531_v20 }
  0x8b   :  { %2345 = vmatpush3.bf16.msra.mxu1 %v2540_v27 }
  0x8c   :  { %2346 = vmatprep.subr.bf16.mxu1 %v2787_v1 }
  0x8d   :  { %283 = vmatpush1.bf16.msra.mxu0 %v2533_v22 }
  0x8e   :  { %2392 = vmatprep.subr.mxu0 %v2787_v1 }
  0x8f   :  { %2347 = vmatpush3.bf16.msra.mxu1 %v2541_v28 }
  0x90   :  { %301 = vmatmul.mubr.bf16.vlgmr.msra.gmra.mrb[0].mxu0 %v107_v26  ;;  %2352 = vmatprep.subr.mxu1 %v2787_v1 }
  0x91   :  { %2394 = vmatprep.mubr.msk.f32.mxu0 %vm2788_vm0, %v2787_v1 }
  0x92   :  { %2349 = vmatmul.mubr.bf16.vlgmr.msra.gmra.mrb[0].mxu1 %v107_v26 }
  0x93   :  { %2354 = vmatprep.mubr.msk.f32.mxu1 %vm2788_vm0, %v2787_v1 }
 0x163   :  { %v2933_v29 = vpop.f32.mrb[0].mxu0 }
 0x164   :  { %v2935_v30 = vpop.f32.mrb[1].mxu0 }
 0x165   :  { %v2937_v31 = vpop.f32.mrb[2].mxu0  ;;  %2353 = vmatpush3.xpose.msk.msra.mxu1 %vm357_vm1, %v2935_v30  ;;  %v2948_v33 = vpop.f32.mrb[0].mxu1 }
 0x166   :  { %v2941_v32 = vpop.f32.mrb[3].mxu0  ;;  %2357 = vmatprep.subr.mxu1 %v2787_v1  ;;  %v2350_v34 = vpop.f32.mrb[1].mxu1 }
 0x167   :  { %v2951_v35 = vpop.f32.mrb[2].mxu1 }
 0x168   :  { %2355 = vmatmul.mubr.msk.f32.vlgmr.msra.gmra.mrb[4].mxu1 %vm357_vm1, %v2933_v29  ;;  %v2351_v36 = vpop.f32.mrb[3].mxu1 }
 0x169   :  { %2359 = vmatprep.mubr.msk.f32.mxu1 %vm2788_vm0, %v2787_v1  ;;  %2358 = vmatpush3.msra.mxu1 %v2948_v33 }
 0x16a   :  { %2362 = vmatprep.subr.mxu1 %v2787_v1 }
 0x23b   :  { %v430_v40 = vpop.f32.mrb[4].mxu1 }
 0x23c   :  { %v434_v42 = vmul.f32 0.17677669, %v430_v40  ;;  %v2356_v43 = vpop.f32.mrb[5].mxu1 }
 0x23e   :  { %v435_v44 = vsel %vm2954_vm2, %v434_v42, -1e+30 }
 0x23f   :  { %v437_v45 = vsel %vm436_vm3, %v435_v44, -inf }
 0x240   :  { %438 = vmax.xlane.f32.xlu0 %v437_v45 }
 0x2cd   :  { %v439_v46 = vpop.xlane.xlu0 %438 }
 0x2ce   :  { %v440_v47 = vsub.f32 %v435_v44, %v439_v46 }
 0x2d0   :  { %v441_v48 = vmul.f32 1.442695, %v440_v47 }
 0x2d2   :  { %2566 = vpow2.f32 %v441_v48 }
 0x2dc   :  { %v2567_v49 = vpop.eup %2566 }
 0x2dd   :  { %v443_v50 = vsel %vm436_vm3, %v2567_v49, 0.0 }
 0x2de   :  { %444 = vadd.xlane.f32.xlu0 %v443_v50 }
 0x2f4   :  { %694 = vrot.lane.b32.xlu0 %v2935_v30, %s2789_s5 }
 0x36b   :  { %v445_v51 = vpop.xlane.xlu0 %444 }
 0x36c   :  { %2568 = vrcp.f32 %v445_v51 }
 0x36f   :  { %v695_v7 = vpop.permute.xlu0 %694 }
 0x376   :  { %v2569_v52 = vpop.eup %2568 }
 0x377   :  { %v447_v53 = vmul.f32 %v2569_v52, %v2567_v49 }
 0x379   :  { %2360 = vmatmul.mubr.msk.f32.vlgmr.msra.gmra.mrb[6].mxu1 %vm436_vm3, %v447_v53 }
 0x37a   :  { %2363 = vmatpush3.xpose.msk.msra.mxu1 %vm357_vm1, %v2941_v32  ;;  %2364 = vmatprep.mubr.msk.f32.mxu1 %vm2788_vm0, %v2787_v1 }
 0x37b   :  { %2367 = vmatprep.subr.mxu1 %v2787_v1 }
 0x37d   :  { %2365 = vmatmul.mubr.msk.f32.vlgmr.msra.gmra.mrb[8].mxu1 %vm357_vm1, %v2937_v31 }
 0x37e   :  { %2368 = vmatpush3.msra.mxu1 %v2951_v35  ;;  %2369 = vmatprep.mubr.msk.f32.mxu1 %vm2788_vm0, %v2787_v1 }
 0x37f   :  { %2372 = vmatprep.subr.mxu1 %v2787_v1 }
 0x44c   :  { %v517_v54 = vpop.f32.mrb[6].mxu1 }
 0x44d   :  { %v521_v55 = vpack.c.bf16 %v517_v54, %v517_v54  ;;  %v2361_v56 = vpop.f32.mrb[7].mxu1 }
 0x44f   :  { %523 = vst.msk [vmem:[#allocation2] sm:$0xf] %vm522_vm4, %v521_v55 }
 0x450   :  { %v596_v57 = vpop.f32.mrb[8].mxu1 }
 0x451   :  { %v600_v58 = vmul.f32 0.17677669, %v596_v57  ;;  %v2366_v59 = vpop.f32.mrb[9].mxu1 }
 0x453   :  { %v601_v60 = vsel %vm2954_vm2, %v600_v58, -1e+30 }
 0x454   :  { %v602_v61 = vsel %vm436_vm3, %v601_v60, -inf }
 0x455   :  { %603 = vmax.xlane.f32.xlu1 %v602_v61 }
 0x4e2   :  { %v604_v62 = vpop.xlane.xlu1 %603 }
 0x4e3   :  { %v605_v63 = vsub.f32 %v601_v60, %v604_v62 }
 0x4e5   :  { %v606_v0 = vmul.f32 1.442695, %v605_v63 }
 0x4e7   :  { %2570 = vpow2.f32 %v606_v0 }
 0x4f1   :  { %v2571_v2 = vpop.eup %2570 }
 0x4f2   :  { %v608_v3 = vsel %vm436_vm3, %v2571_v2, 0.0 }
 0x4f3   :  { %609 = vadd.xlane.f32.xlu1 %v608_v3 }
 0x504   :  { %692 = vrot.lane.b32.xlu1 %v2933_v29, %s2789_s5 }
 0x580   :  { %v610_v4 = vpop.xlane.xlu1 %609 }
 0x581   :  { %2572 = vrcp.f32 %v610_v4 }
 0x584   :  { %v693_v8 = vpop.permute.xlu1 %692 }
 0x58b   :  { %v2573_v5 = vpop.eup %2572 }
 0x58c   :  { %v612_v6 = vmul.f32 %v2573_v5, %v2571_v2 }
 0x58e   :  { %2370 = vmatmul.mubr.msk.f32.vlgmr.msra.gmra.mrb[10].mxu1 %vm436_vm3, %v612_v6 }
 0x58f   :  { %2373 = vmatpush3.xpose.msk.msra.mxu1 %vm357_vm1, %v695_v7  ;;  %2374 = vmatprep.mubr.msk.f32.mxu1 %vm2788_vm0, %v2787_v1 }
 0x590   :  { %2377 = vmatprep.subr.mxu1 %v2787_v1 }
 0x592   :  { %2375 = vmatmul.mubr.msk.f32.vlgmr.msra.gmra.mrb[12].mxu1 %vm357_vm1, %v693_v8 }
 0x593   :  { %2379 = vmatprep.mubr.msk.f32.mxu1 %vm2788_vm0, %v2787_v1 }
 0x661   :  { %v682_v9 = vpop.f32.mrb[10].mxu1 }
 0x662   :  { %v686_v10 = vpack.c.bf16 %v682_v9, %v682_v9  ;;  %v2371_v11 = vpop.f32.mrb[11].mxu1 }
 0x664   :  { %v688_v12 = vrot.slane %v686_v10, 4 }
 0x665   :  { %v766_v13 = vpop.f32.mrb[12].mxu1 }
 0x666   :  { %691 = vst.msk [vmem:[#allocation2] sm:$0xf0] %vm690_vm5, %v688_v12  ;;  %v770_v14 = vmul.f32 0.17677669, %v766_v13  ;;  %v2376_v15 = vpop.f32.mrb[13].mxu1 }
 0x668   :  { %v771_v16 = vsel %vm2954_vm2, %v770_v14, -1e+30 }
 0x669   :  { %v772_v17 = vsel %vm436_vm3, %v771_v16, -inf }
 0x66a   :  { %773 = vmax.xlane.f32.xlu1 %v772_v17 }
 0x67b   :  { %869 = vrot.lane.b32.xlu1 %v2941_v32, %s2789_s5 }
 0x67f   :  { %867 = vrot.lane.b32.xlu1 %v2937_v31, %s2789_s5 }
 0x683   :  { %1045 = vrot.lane.b32.xlu1 %v2935_v30, %s2779_s22 }
 0x687   :  { %1219 = vrot.lane.b32.xlu1 %v2941_v32, %s2779_s22 }
 0x68b   :  { %1394 = vrot.lane.b32.xlu1 %v2935_v30, %s2790_s17 }
 0x68f   :  { %1568 = vrot.lane.b32.xlu1 %v2941_v32, %s2790_s17 }
 0x6f7   :  { %v774_v18 = vpop.xlane.xlu1 %773 }
 0x6f8   :  { %v775_v19 = vsub.f32 %v771_v16, %v774_v18 }
 0x6fa   :  { %v776_v20 = vmul.f32 1.442695, %v775_v19 }
 0x6fb   :  { %v870_v21 = vpop.permute.xlu1 %869 }
 0x6fc   :  { %2574 = vpow2.f32 %v776_v20 }
 0x6ff   :  { %v868_v22 = vpop.permute.xlu1 %867 }
 0x703   :  { %v1046_v25 = vpop.permute.xlu1 %1045 }
 0x704   :  { %2393 = vmatpush3.xpose.msk.msra.mxu0 %vm357_vm1, %v1046_v25 }
 0x705   :  { %2402 = vmatprep.subr.mxu0 %v2787_v1 }
 0x706   :  { %v2575_v26 = vpop.eup %2574 }
 0x707   :  { %v778_v27 = vsel %vm436_vm3, %v2575_v26, 0.0  ;;  %v1220_v32 = vpop.permute.xlu1 %1219 }
 0x708   :  { %779 = vadd.xlane.f32.xlu0 %v778_v27 }
 0x71e   :  { %784 = vrot.lane.b32.xlu0 %v2948_v33, %s2789_s5 }
 0x722   :  { %1043 = vrot.lane.b32.xlu0 %v2933_v29, %s2779_s22 }
 0x726   :  { %1217 = vrot.lane.b32.xlu0 %v2937_v31, %s2779_s22 }
 0x72a   :  { %1392 = vrot.lane.b32.xlu0 %v2933_v29, %s2790_s17  ;;  %v1395_v29 = vpop.permute.xlu1 %1394 }
 0x72e   :  { %1566 = vrot.lane.b32.xlu0 %v2937_v31, %s2790_s17  ;;  %v1569_v39 = vpop.permute.xlu1 %1568 }
 0x795   :  { %v780_v28 = vpop.xlane.xlu0 %779 }
 0x796   :  { %2576 = vrcp.f32 %v780_v28 }
 0x799   :  { %v785_v30 = vpop.permute.xlu0 %784 }
 0x79a   :  { %2378 = vmatpush3.msra.mxu1 %v785_v30 }
 0x79b   :  { %2382 = vmatprep.subr.mxu1 %v2787_v1 }
 0x79d   :  { %v1044_v34 = vpop.permute.xlu0 %1043 }
 0x79e   :  { %2395 = vmatmul.mubr.msk.f32.vlgmr.msra.gmra.mrb[4].mxu0 %vm357_vm1, %v1044_v34 }
 0x79f   :  { %2403 = vmatpush3.xpose.msk.msra.mxu0 %vm357_vm1, %v1220_v32  ;;  %2404 = vmatprep.mubr.msk.f32.mxu0 %vm2788_vm0, %v2787_v1 }
 0x7a0   :  { %v2577_v36 = vpop.eup %2576  ;;  %2412 = vmatprep.subr.mxu0 %v2787_v1 }
 0x7a1   :  { %v782_v31 = vmul.f32 %v2577_v36, %v2575_v26  ;;  %v1218_v37 = vpop.permute.xlu0 %1217 }
 0x7a2   :  { %2405 = vmatmul.mubr.msk.f32.vlgmr.msra.gmra.mrb[6].mxu0 %vm357_vm1, %v1218_v37 }
 0x7a3   :  { %2413 = vmatpush3.xpose.msk.msra.mxu0 %vm357_vm1, %v1395_v29  ;;  %2380 = vmatmul.mubr.msk.f32.vlgmr.msra.gmra.mrb[14].mxu1 %vm436_vm3, %v782_v31 }
 0x7a4   :  { %2383 = vmatpush3.xpose.msk.msra.mxu1 %vm357_vm1, %v870_v21  ;;  %2414 = vmatprep.mubr.msk.f32.mxu0 %vm2788_vm0, %v2787_v1 }
 0x7a5   :  { %v1393_v38 = vpop.permute.xlu0 %1392  ;;  %2422 = vmatprep.subr.mxu0 %v2787_v1  ;;  %2384 = vmatprep.mubr.msk.f32.mxu1 %vm2788_vm0, %v2787_v1 }
 0x7a6   :  { %2415 = vmatmul.mubr.msk.f32.vlgmr.msra.gmra.mrb[8].mxu0 %vm357_vm1, %v1393_v38  ;;  %2387 = vmatprep.subr.mxu1 %v2787_v1 }
 0x7a7   :  { %2423 = vmatpush3.xpose.msk.msra.mxu0 %vm357_vm1, %v1569_v39  ;;  %2385 = vmatmul.mubr.msk.f32.vlgmr.msra.gmra.mrb[16].mxu1 %vm357_vm1, %v868_v22 }
 0x7a8   :  { %2424 = vmatprep.mubr.msk.f32.mxu0 %vm2788_vm0, %v2787_v1  ;;  %2389 = vmatprep.mubr.msk.f32.mxu1 %vm2788_vm0, %v2787_v1 }
 0x7a9   :  { %v1567_v40 = vpop.permute.xlu0 %1566  ;;  %2432 = vmatprep.subr.bf16.mxu0 %v2787_v1 }
 0x7aa   :  { %2425 = vmatmul.mubr.msk.f32.vlgmr.msra.gmra.mrb[10].mxu0 %vm357_vm1, %v1567_v40 }
 0x7ab   :  { %2448 = vmatprep.mubr.msk.bf16.mxu0 %vm2788_vm0, %v2787_v1 }
 0x871   :  { %v1117_v42 = vpop.f32.mrb[4].mxu0 }
 0x872   :  { %v1121_v43 = vmul.f32 0.17677669, %v1117_v42  ;;  %v2396_v44 = vpop.f32.mrb[5].mxu0 }
 0x874   :  { %v1122_v45 = vsel %vm2954_vm2, %v1121_v43, -1e+30 }
 0x875   :  { %v1291_v46 = vpop.f32.mrb[6].mxu0  ;;  %v1123_v47 = vsel %vm436_vm3, %v1122_v45, -inf }
 0x876   :  { %v1295_v48 = vmul.f32 0.17677669, %v1291_v46  ;;  %1124 = vmax.xlane.f32.xlu0 %v1123_v47  ;;  %v3048_v49 = vpop.f32.mrb[14].mxu1  ;;  %v2406_v50 = vpop.f32.mrb[7].mxu0 }
 0x877   :  { %v2381_v51 = vpop.f32.mrb[15].mxu1  ;;  %v860_v36 = vpack.c.bf16 %v3048_v49, %v3048_v49 }
 0x878   :  { %v1296_v52 = vsel %vm2954_vm2, %v1295_v48, -1e+30 }
 0x879   :  { %v1466_v53 = vpop.f32.mrb[8].mxu0  ;;  %v1297_v54 = vsel %vm436_vm3, %v1296_v52, -inf }
 0x87a   :  { %v1470_v55 = vmul.f32 0.17677669, %v1466_v53  ;;  %1298 = vmax.xlane.f32.xlu0 %v1297_v54  ;;  %v941_v56 = vpop.f32.mrb[16].mxu1  ;;  %v2416_v57 = vpop.f32.mrb[9].mxu0 }
 0x87b   :  { %v945_v58 = vmul.f32 0.17677669, %v941_v56  ;;  %v2386_v59 = vpop.f32.mrb[17].mxu1  ;;  %v2543_v56 = vld [vmem:[#allocation8 + $0x8] sm:$0xff]   ;;  %v2544_v57 = vld [vmem:[#allocation8 + $0x10] sm:$0xff]  }
 0x87c   :  { %v1471_v60 = vsel %vm2954_vm2, %v1470_v55, -1e+30  ;;  %v2542_v55 = vld [vmem:[#allocation8] sm:$0xff]  }
 0x87d   :  { %v1640_v61 = vpop.f32.mrb[10].mxu0  ;;  %v1472_v62 = vsel %vm436_vm3, %v1471_v60, -inf  ;;  %v946_v63 = vsel %vm2954_vm2, %v945_v58, -1e+30  ;;  %2433 = vmatpush3.bf16.msra.mxu0 %v2542_v55  ;;  %v2545_v58 = vld [vmem:[#allocation8 + $0x18] sm:$0xff]  }
 0x87e   :  { %v1644_v0 = vmul.f32 0.17677669, %v1640_v61  ;;  %1473 = vmax.xlane.f32.xlu0 %v1472_v62  ;;  %v2426_v2 = vpop.f32.mrb[11].mxu0  ;;  %v947_v3 = vsel %vm436_vm3, %v946_v63, -inf  ;;  %2434 = vmatprep.subr.bf16.mxu0 %v2787_v1 }
 0x87f   :  { %948 = vmax.xlane.f32.xlu1 %v947_v3 }
 0x880   :  { %v1645_v4 = vsel %vm2954_vm2, %v1644_v0, -1e+30 }
 0x881   :  { %v1646_v5 = vsel %vm436_vm3, %v1645_v4, -inf  ;;  %2435 = vmatpush3.bf16.msra.mxu0 %v2543_v56 }
 0x882   :  { %2436 = vmatprep.subr.bf16.mxu0 %v2787_v1 }
 0x883   :  { %1647 = vmax.xlane.f32.xlu1 %v1646_v5 }
 0x885   :  { %2437 = vmatpush3.bf16.msra.mxu0 %v2544_v57 }
 0x886   :  { %2438 = vmatprep.subr.bf16.mxu0 %v2787_v1 }
 0x889   :  { %2439 = vmatpush3.bf16.msra.mxu0 %v2545_v58  ;;  %v2243_v58 = vld [vmem:[#allocation12 + $0x1] ss:$0 sm:$0xff] }
 0x88a   :  { %2440 = vmatprep.subr.bf16.mxu0 %v2787_v1 }
 0x903   :  { %v1125_v6 = vpop.xlane.xlu0 %1124 }
 0x904   :  { %v1126_v7 = vsub.f32 %v1122_v45, %v1125_v6  ;;  %v2548_v6 = vld [vmem:[#allocation8 + $0x30] sm:$0xff]  }
 0x906   :  { %v1127_v8 = vmul.f32 1.442695, %v1126_v7 }
 0x907   :  { %v1299_v9 = vpop.xlane.xlu0 %1298 }
 0x908   :  { %2578 = vpow2.f32 %v1127_v8  ;;  %v1300_v10 = vsub.f32 %v1296_v52, %v1299_v9  ;;  %v2549_v9 = vld [vmem:[#allocation8 + $0x38] sm:$0xff]  }
 0x90a   :  { %v1301_v11 = vmul.f32 1.442695, %v1300_v10 }
 0x90b   :  { %v1474_v12 = vpop.xlane.xlu0 %1473 }
 0x90c   :  { %2580 = vpow2.f32 %v1301_v11  ;;  %v1475_v13 = vsub.f32 %v1471_v60, %v1474_v12  ;;  %v949_v14 = vpop.xlane.xlu1 %948  ;;  %v2546_v60 = vld [vmem:[#allocation8 + $0x20] sm:$0xff]  }
 0x90d   :  { %v950_v16 = vsub.f32 %v946_v63, %v949_v14  ;;  %2441 = vmatpush3.bf16.msra.mxu0 %v2546_v60  ;;  %v2547_v63 = vld [vmem:[#allocation8 + $0x28] sm:$0xff]  }
 0x90e   :  { %v1476_v15 = vmul.f32 1.442695, %v1475_v13  ;;  %2442 = vmatprep.subr.bf16.mxu0 %v2787_v1 }
 0x90f   :  { %v951_v19 = vmul.f32 1.442695, %v950_v16 }
 0x910   :  { %2582 = vpow2.f32 %v1476_v15  ;;  %v1648_v17 = vpop.xlane.xlu1 %1647 }
 0x911   :  { %v1649_v41 = vsub.f32 %v1645_v4, %v1648_v17  ;;  %2443 = vmatpush3.bf16.msra.mxu0 %v2547_v63  ;;  %v2558_v63 = vld [vmem:[#allocation11] sm:$0xff]  }
 0x912   :  { %v2579_v18 = vpop.eup %2578  ;;  %2444 = vmatprep.subr.bf16.mxu0 %v2787_v1 }
 0x913   :  { %v1650_v20 = vmul.f32 1.442695, %v1649_v41  ;;  %v1129_v21 = vsel %vm436_vm3, %v2579_v18, 0.0 }
 0x914   :  { %1130 = vadd.xlane.f32.xlu1 %v1129_v21 }
 0x915   :  { %2584 = vpow2.f32 %v1650_v20  ;;  %2445 = vmatpush3.bf16.msra.mxu0 %v2548_v6  ;;  %v2564_v6 = vld [vmem:[#allocation11 + $0x30] sm:$0xff]  }
 0x916   :  { %v2581_v22 = vpop.eup %2580  ;;  %2586 = vpow2.f32 %v951_v19  ;;  %2446 = vmatprep.subr.bf16.mxu0 %v2787_v1 }
 0x917   :  { %v1303_v25 = vsel %vm436_vm3, %v2581_v22, 0.0 }
 0x918   :  { %1304 = vadd.xlane.f32.xlu0 %v1303_v25 }
 0x919   :  { %2447 = vmatpush3.bf16.msra.mxu0 %v2549_v9 }
 0x91a   :  { %v2583_v26 = vpop.eup %2582  ;;  %2472 = vmatprep.subr.bf16.mxu0 %v2787_v1 }
 0x91b   :  { %v1478_v27 = vsel %vm436_vm3, %v2583_v26, 0.0 }
 0x91c   :  { %1479 = vadd.xlane.f32.xlu1 %v1478_v27 }
 0x91f   :  { %v2585_v28 = vpop.eup %2584 }
 0x920   :  { %v1652_v30 = vsel %vm436_vm3, %v2585_v28, 0.0  ;;  %v2587_v32 = vpop.eup %2586 }
 0x921   :  { %1653 = vadd.xlane.f32.xlu0 %v1652_v30  ;;  %v953_v34 = vsel %vm436_vm3, %v2587_v32, 0.0 }
 0x925   :  { %954 = vadd.xlane.f32.xlu0 %v953_v34  ;;  %v2550_v34 = vld [vmem:[#allocation9] sm:$0xff]  }
 0x92d   :  { %959 = vrot.lane.b32.xlu1 %v2951_v35, %s2789_s5 }
 0x931   :  { %1308 = vrot.lane.b32.xlu1 %v2951_v35, %s2779_s22 }
 0x935   :  { %1483 = vrot.lane.b32.xlu1 %v2948_v33, %s2790_s17 }
 0x939   :  { %1657 = vrot.lane.b32.xlu1 %v2951_v35, %s2790_s17 }
 0x93b   :  { %1134 = vrot.lane.b32.xlu0 %v2948_v33, %s2779_s22 }
 0x93f   :  { %862 = vrot.lane.b32.xlu0 %v860_v36, %s2790_s17 }
 0x9a1   :  { %v1131_v29 = vpop.xlane.xlu1 %1130 }
 0x9a5   :  { %v1305_v37 = vpop.xlane.xlu0 %1304 }
 0x9a9   :  { %v1480_v31 = vpop.xlane.xlu1 %1479 }
 0x9ad   :  { %v960_v38 = vpop.permute.xlu1 %959 }
 0x9ae   :  { %v1654_v39 = vpop.xlane.xlu0 %1653  ;;  %2388 = vmatpush3.msra.mxu1 %v960_v38 }
 0x9af   :  { %2397 = vmatprep.subr.mxu1 %v2787_v1 }
 0x9b1   :  { %v1309_v45 = vpop.permute.xlu1 %1308 }
 0x9b2   :  { %v955_v40 = vpop.xlane.xlu0 %954 }
 0x9b3   :  { %2588 = vrcp.f32 %v955_v40 }
 0x9b4   :  { %2590 = vrcp.f32 %v1131_v29 }
 0x9b5   :  { %2592 = vrcp.f32 %v1305_v37  ;;  %v1484_v49 = vpop.permute.xlu1 %1483 }
 0x9b6   :  { %v1135_v35 = vpop.permute.xlu0 %1134  ;;  %2594 = vrcp.f32 %v1480_v31 }
 0x9b7   :  { %2596 = vrcp.f32 %v1654_v39 }
 0x9b9   :  { %v1658_v53 = vpop.permute.xlu1 %1657 }
 0x9ba   :  { %v863_v33 = vpop.permute.xlu0 %862 }
 0x9bb   :  { %866 = vst.msk [vmem:[#allocation2] sm:$0xf] %vm865_vm6, %v863_v33  ;;  %v2553_v33 = vld [vmem:[#allocation9 + $0x18] sm:$0xff]  }
 0x9bd   :  { %v2589_v42 = vpop.eup %2588 }
 0x9be   :  { %v957_v43 = vmul.f32 %v2589_v42, %v2587_v32  ;;  %v2591_v44 = vpop.eup %2590  ;;  %v2554_v42 = vld [vmem:[#allocation9 + $0x20] sm:$0xff]  }
 0x9bf   :  { %v1133_v46 = vmul.f32 %v2591_v44, %v2579_v18  ;;  %v2593_v47 = vpop.eup %2592  ;;  %v2556_v44 = vld [vmem:[#allocation9 + $0x30] sm:$0xff]  }
 0x9c0   :  { %2390 = vmatmul.mubr.msk.f32.vlgmr.msra.gmra.mrb[18].mxu1 %vm436_vm3, %v957_v43  ;;  %v1307_v48 = vmul.f32 %v2593_v47, %v2581_v22  ;;  %v2595_v50 = vpop.eup %2594  ;;  %v2555_v43 = vld [vmem:[#allocation9 + $0x28] sm:$0xff]  }
 0x9c1   :  { %2398 = vmatpush3.msra.mxu1 %v1135_v35  ;;  %2399 = vmatprep.mubr.msk.f32.mxu1 %vm2788_vm0, %v2787_v1  ;;  %v1482_v51 = vmul.f32 %v2595_v50, %v2583_v26  ;;  %v2597_v52 = vpop.eup %2596  ;;  %v2551_v35 = vld [vmem:[#allocation9 + $0x8] sm:$0xff]  }
 0x9c2   :  { %2407 = vmatprep.subr.mxu1 %v2787_v1  ;;  %v1656_v54 = vmul.f32 %v2597_v52, %v2585_v28 }
 0x9c4   :  { %2400 = vmatmul.mubr.msk.f32.vlgmr.msra.gmra.mrb[20].mxu1 %vm436_vm3, %v1133_v46 }
 0x9c5   :  { %2408 = vmatpush3.msra.mxu1 %v1309_v45  ;;  %2409 = vmatprep.mubr.msk.f32.mxu1 %vm2788_vm0, %v2787_v1  ;;  %v2557_v45 = vld [vmem:[#allocation9 + $0x38] sm:$0xff]  }
 0x9c6   :  { %2417 = vmatprep.subr.mxu1 %v2787_v1 }
 0x9c8   :  { %2410 = vmatmul.mubr.msk.f32.vlgmr.msra.gmra.mrb[22].mxu1 %vm436_vm3, %v1307_v48 }
 0x9c9   :  { %2418 = vmatpush3.msra.mxu1 %v1484_v49  ;;  %2419 = vmatprep.mubr.msk.f32.mxu1 %vm2788_vm0, %v2787_v1 }
 0x9ca   :  { %2427 = vmatprep.subr.mxu1 %v2787_v1 }
 0x9cc   :  { %2420 = vmatmul.mubr.msk.f32.vlgmr.msra.gmra.mrb[24].mxu1 %vm436_vm3, %v1482_v51 }
 0x9cd   :  { %2428 = vmatpush3.msra.mxu1 %v1658_v53  ;;  %2429 = vmatprep.mubr.msk.f32.mxu1 %vm2788_vm0, %v2787_v1 }
 0x9ce   :  { %2452 = vmatprep.subr.bf16.mxu1 %v2787_v1 }
 0x9d0   :  { %2430 = vmatmul.mubr.msk.f32.vlgmr.msra.gmra.mrb[26].mxu1 %vm436_vm3, %v1656_v54  ;;  %v2242_v54 = vld [vmem:[#allocation12] ss:$0 sm:$0xff] }
 0x9d1   :  { %2468 = vmatprep.mubr.msk.bf16.mxu1 %vm2788_vm0, %v2787_v1  ;;  %2453 = vmatpush3.bf16.msra.mxu1 %v2550_v34 }
 0x9d2   :  { %2454 = vmatprep.subr.bf16.mxu1 %v2787_v1 }
 0x9d5   :  { %2455 = vmatpush3.bf16.msra.mxu1 %v2551_v35 }
 0x9d6   :  { %2456 = vmatprep.subr.bf16.mxu1 %v2787_v1 }
 0xa93   :  { %v1031_v59 = vpop.f32.mrb[18].mxu1 }
 0xa94   :  { %v1035_v61 = vpack.c.bf16 %v1031_v59, %v1031_v59  ;;  %v2391_v62 = vpop.f32.mrb[19].mxu1 }
 0xa96   :  { %v1037_v0 = vrot.slane %v1035_v61, 4 }
 0xa97   :  { %v1206_v2 = vpop.f32.mrb[20].mxu1 }
 0xa98   :  { %v1210_v3 = vpack.c.bf16 %v1206_v2, %v1206_v2  ;;  %1038 = vrot.lane.b32.xlu1 %v1037_v0, %s2790_s17  ;;  %v2401_v4 = vpop.f32.mrb[21].mxu1  ;;  %v2559_v0 = vld [vmem:[#allocation11 + $0x8] sm:$0xff]   ;;  %v2560_v2 = vld [vmem:[#allocation11 + $0x10] sm:$0xff]  }
 0xa99   :  { %v2562_v4 = vld [vmem:[#allocation11 + $0x20] sm:$0xff]  }
 0xa9a   :  { %1212 = vrot.lane.b32.xlu0 %v1210_v3, %s2779_s22  ;;  %v2561_v3 = vld [vmem:[#allocation11 + $0x18] sm:$0xff]  }
 0xa9b   :  { %v1380_v5 = vpop.f32.mrb[22].mxu1 }
 0xa9c   :  { %v1384_v7 = vpack.c.bf16 %v1380_v5, %v1380_v5  ;;  %v2411_v8 = vpop.f32.mrb[23].mxu1  ;;  %v2563_v5 = vld [vmem:[#allocation11 + $0x28] sm:$0xff]  }
 0xa9d   :  { %v2244_v8 = vld [vmem:[#allocation12 + $0x2] ss:$0 sm:$0xff] }
 0xa9e   :  { %v1386_v10 = vrot.slane %v1384_v7, 4  ;;  %v2565_v7 = vld [vmem:[#allocation11 + $0x38] sm:$0xff]  }
 0xa9f   :  { %v1555_v11 = vpop.f32.mrb[24].mxu1 }
 0xaa0   :  { %v1559_v12 = vpack.c.bf16 %v1555_v11, %v1555_v11  ;;  %1387 = vrot.lane.b32.xlu1 %v1386_v10, %s2779_s22  ;;  %v2421_v13 = vpop.f32.mrb[25].mxu1  ;;  %s2791_s22 = smov [#allocation14]  }
 0xaa1   :  { %s2171_s0 = sshll.u32 %s2791_s22, 4  ;;  %s2172_s0 = int_to_ptr.vmem [resolvable:$true] %s2171_s0 }
 0xaa2   :  { %1561 = vrot.lane.b32.xlu0 %v1559_v12, %s2789_s5  ;;  %s2742_s14 = scalar_lea.vmem %s2172_s0, 256  ;;  %p2747_p7 = scmp.lt.s32.totalorder %s2172_s0, %s2172_s0 }
 0xaa3   :  { %v1729_v14 = vpop.f32.mrb[26].mxu1  ;;  %p2743_p6 = scmp.ne.s32.totalorder %s2172_s0, %s2742_s14  ;;  %p2748_p8 = scmp.lt.s32.totalorder %s2742_s14, %s2742_s14 }
 0xaa4   :  { %v1733_v15 = vpack.c.bf16 %v1729_v14, %v1729_v14  ;;  %v2431_v16 = vpop.f32.mrb[27].mxu1 }
 0xaa5   :  { %p2749_p9 = por %p2748_p8, %p2747_p7 }
 0xaa6   :  { %v1735_v17 = vrot.slane %v1733_v15, 4 }
 0xaa7   :  { %p2750_p10 = pnand %p2749_p9, %p2743_p6 }
 0xaa8   :  { %1736 = vrot.lane.b32.xlu1 %v1735_v17, %s2789_s5 }
 0xb0a   :  { %v1039_v41 = vpop.permute.xlu1 %1038 }
 0xb0b   :  { %1042 = vst.msk [vmem:[#allocation2] sm:$0xf0] %vm1041_vm7, %v1039_v41 }
 0xb0c   :  { %v1213_v18 = vpop.permute.xlu0 %1212 }
 0xb0d   :  { %1216 = vst.msk [vmem:[#allocation2] sm:$0xf] %vm1215_vm8, %v1213_v18 }
 0xb12   :  { %v1388_v19 = vpop.permute.xlu1 %1387 }
 0xb13   :  { %1391 = vst.msk [vmem:[#allocation2] sm:$0xf0] %vm1390_vm9, %v1388_v19 }
 0xb14   :  { %v1562_v20 = vpop.permute.xlu0 %1561 }
 0xb15   :  { %1565 = vst.msk [vmem:[#allocation2] sm:$0xf] %vm1564_vm10, %v1562_v20 }
 0xb1a   :  { %v1737_v21 = vpop.permute.xlu1 %1736 }
 0xb1b   :  { %1740 = vst.msk [vmem:[#allocation2] sm:$0xf0] %vm1739_vm11, %v1737_v21 }
 0xb22   :  { %v1741_v22 = vld [vmem:[#allocation2] sm:$0xff] }
 0xb23   :  { %2449 = vmatmul.mubr.bf16.vlgmr.msra.gmra.mrb[12].mxu0 %v1741_v22 }
 0xb24   :  { %2488 = vmatprep.mubr.msk.bf16.mxu0 %vm2788_vm0, %v2787_v1  ;;  %2473 = vmatpush3.bf16.msra.mxu0 %v2558_v63 }
 0xb25   :  { %2474 = vmatprep.subr.bf16.mxu0 %v2787_v1 }
 0xb28   :  { %2475 = vmatpush3.bf16.msra.mxu0 %v2559_v0 }
 0xb29   :  { %2476 = vmatprep.subr.bf16.mxu0 %v2787_v1 }
 0xb2c   :  { %2477 = vmatpush3.bf16.msra.mxu0 %v2560_v2 }
 0xb2d   :  { %2478 = vmatprep.subr.bf16.mxu0 %v2787_v1 }
 0xb30   :  { %2479 = vmatpush3.bf16.msra.mxu0 %v2561_v3 }
 0xb31   :  { %2480 = vmatprep.subr.bf16.mxu0 %v2787_v1 }
 0xb34   :  { %2481 = vmatpush3.bf16.msra.mxu0 %v2562_v4 }
 0xb35   :  { %2482 = vmatprep.subr.bf16.mxu0 %v2787_v1 }
 0xb38   :  { %2483 = vmatpush3.bf16.msra.mxu0 %v2563_v5 }
 0xb39   :  { %2484 = vmatprep.subr.bf16.mxu0 %v2787_v1 }
 0xb3c   :  { %2485 = vmatpush3.bf16.msra.mxu0 %v2564_v6 }
 0xb3d   :  { %2486 = vmatprep.subr.bf16.mxu0 %v2787_v1 }
 0xb40   :  { %2487 = vmatpush3.bf16.msra.mxu0 %v2565_v7 }
 0xbf6   :  { %v1840_v25 = vpop.f32.mrb[12].mxu0 }
 0xbf7   :  { %v1847_v26 = vadd.f32 %v1840_v25, %v2917_v23  ;;  %v2450_v27 = vpop.f32.mrb[13].mxu0 }
 0xbf8   :  { %v1843_v28 = vpop.f32.mrb[14].mxu0 }
 0xbf9   :  { %v1848_v30 = vadd.f32 %v1843_v28, %v2919_v24  ;;  %1851 = vadd.xlane.f32.xlu0 %v1847_v26  ;;  %v2451_v32 = vpop.f32.mrb[15].mxu0  ;;  %v2552_v24 = vld [vmem:[#allocation9 + $0x10] sm:$0xff]  }
 0xbfa   :  { %2457 = vmatpush3.bf16.msra.mxu1 %v2552_v24 }
 0xbfb   :  { %1853 = vadd.xlane.f32.xlu1 %v1848_v30  ;;  %2458 = vmatprep.subr.bf16.mxu1 %v2787_v1 }
 0xbfe   :  { %2459 = vmatpush3.bf16.msra.mxu1 %v2553_v33 }
 0xbff   :  { %2460 = vmatprep.subr.bf16.mxu1 %v2787_v1 }
 0xc02   :  { %2461 = vmatpush3.bf16.msra.mxu1 %v2554_v42 }
 0xc03   :  { %2462 = vmatprep.subr.bf16.mxu1 %v2787_v1 }
 0xc06   :  { %2463 = vmatpush3.bf16.msra.mxu1 %v2555_v43 }
 0xc07   :  { %2464 = vmatprep.subr.bf16.mxu1 %v2787_v1 }
 0xc0a   :  { %2465 = vmatpush3.bf16.msra.mxu1 %v2556_v44 }
 0xc0b   :  { %2466 = vmatprep.subr.bf16.mxu1 %v2787_v1 }
 0xc0e   :  { %2467 = vmatpush3.bf16.msra.mxu1 %v2557_v45 }
 0xc86   :  { %v1852_v36 = vpop.xlane.xlu0 %1851 }
 0xc87   :  { %v1856_v29 = vmul.f32 0.0078125, %v1852_v36 }
 0xc88   :  { %v1854_v31 = vpop.xlane.xlu1 %1853 }
 0xc89   :  { %v1858_v37 = vsub.f32 %v1847_v26, %v1856_v29  ;;  %v1857_v38 = vmul.f32 0.0078125, %v1854_v31  ;;  %v2253_v31 = vld [vmem:[#allocation12 + $0x3] ss:$0 sm:$0xff] }
 0xc8b   :  { %v1859_v39 = vsub.f32 %v1848_v30, %v1857_v38  ;;  %v1860_v40 = vmul.f32 %v1858_v37, %v1858_v37 }
 0xc8d   :  { %1862 = vadd.xlane.f32.xlu0 %v1860_v40  ;;  %v1861_v23 = vmul.f32 %v1859_v39, %v1859_v39 }
 0xc91   :  { %1864 = vadd.xlane.f32.xlu0 %v1861_v23 }
 0xd1a   :  { %v1863_v46 = vpop.xlane.xlu0 %1862 }
 0xd1b   :  { %v1866_v47 = vmul.f32 0.0078125, %v1863_v46 }
 0xd1d   :  { %v1868_v48 = vadd.f32 1e-05, %v1866_v47 }
 0xd1e   :  { %v1865_v49 = vpop.xlane.xlu0 %1864 }
 0xd1f   :  { %2598 = vrsqrt.f32 %v1868_v48  ;;  %v1867_v50 = vmul.f32 0.0078125, %v1865_v49 }
 0xd21   :  { %v1869_v51 = vadd.f32 1e-05, %v1867_v50 }
 0xd23   :  { %2600 = vrsqrt.f32 %v1869_v51 }
 0xd29   :  { %v2599_v52 = vpop.eup %2598 }
 0xd2a   :  { %v1872_v53 = vmul.f32 %v2599_v52, %v1858_v37 }
 0xd2c   :  { %v1878_v57 = vmul.f32 %v2242_v54, %v1872_v53 }
 0xd2d   :  { %v2601_v55 = vpop.eup %2600 }
 0xd2e   :  { %v1873_v56 = vmul.f32 %v2601_v55, %v1859_v39  ;;  %v3124_v60 = vadd.f32 %v2243_v58, %v1878_v57  ;;  %v2262_v57 = vld [vmem:[#allocation12 + $0x4] ss:$0 sm:$0xff] }
 0xd30   :  { %v1879_v59 = vmul.f32 %v2242_v54, %v1873_v56 }
 0xd32   :  { %v3126_v61 = vadd.f32 %v2243_v58, %v1879_v59 }
 0xd34   :  { %v1886_v62 = vpack.c.bf16 %v3126_v61, %v3124_v60 }
 0xd36   :  { %2469 = vmatmul.mubr.bf16.vlgmr.msra.gmra.mrb[28].mxu1 %v1886_v62 }
 0xe09   :  { %v1990_v9 = vpop.f32.mrb[28].mxu1 }
 0xe0a   :  { %v1991_v10 = vadd.f32 %v2244_v8, %v1990_v9  ;;  %v2470_v11 = vpop.f32.mrb[29].mxu1 }
 0xe0b   :  { %v1993_v12 = vpop.f32.mrb[30].mxu1 }
 0xe0c   :  { %v1999_v13 = vmul.f32 0.044715, %v1991_v10  ;;  %v1994_v14 = vadd.f32 %v2244_v8, %v1993_v12  ;;  %v2471_v15 = vpop.f32.mrb[31].mxu1  ;;  %v1997_v28 = vmul.f32 0.5, %v1991_v10 }
 0xe0e   :  { %v2001_v16 = vmul.f32 %v1999_v13, %v1991_v10  ;;  %v2000_v17 = vmul.f32 0.044715, %v1994_v14  ;;  %v1998_v30 = vmul.f32 0.5, %v1994_v14 }
 0xe10   :  { %v2003_v41 = vmul.f32 %v2001_v16, %v1991_v10  ;;  %v2002_v18 = vmul.f32 %v2000_v17, %v1994_v14 }
 0xe12   :  { %v2005_v19 = vadd.f32 %v2003_v41, %v1991_v10  ;;  %v2004_v20 = vmul.f32 %v2002_v18, %v1994_v14 }
 0xe14   :  { %v2007_v21 = vmul.f32 0.7978846, %v2005_v19  ;;  %v2006_v22 = vadd.f32 %v2004_v20, %v1994_v14 }
 0xe16   :  { %2602 = vtanh.f32 %v2007_v21  ;;  %v2008_v25 = vmul.f32 0.7978846, %v2006_v22 }
 0xe18   :  { %2604 = vtanh.f32 %v2008_v25 }
 0xe20   :  { %v2603_v1 = vpop.eup %2602 }
 0xe21   :  { %v2011_v26 = vadd.f32 1.0, %v2603_v1 }
 0xe22   :  { %v2605_v27 = vpop.eup %2604 }
 0xe23   :  { %v2012_v32 = vadd.f32 1.0, %v2605_v27  ;;  %v2013_v34 = vmul.f32 %v2011_v26, %v1997_v28 }
 0xe25   :  { %v2014_v36 = vmul.f32 %v2012_v32, %v1998_v30 }
 0xe27   :  { %v2015_v29 = vpack.c.bf16 %v2014_v36, %v2013_v34 }
 0xe29   :  { %2489 = vmatmul.mubr.bf16.vlgmr.msra.gmra.mrb[16].mxu0 %v2015_v29 }
 0xefc   :  { %v2119_v37 = vpop.f32.mrb[16].mxu0 }
 0xefd   :  { %v2120_v38 = vadd.f32 %v2253_v31, %v2119_v37  ;;  %v2490_v39 = vpop.f32.mrb[17].mxu0 }
 0xefe   :  { %v2122_v40 = vpop.f32.mrb[18].mxu0 }
 0xeff   :  { %v2123_v23 = vadd.f32 %v2253_v31, %v2122_v40  ;;  %v2491_v35 = vpop.f32.mrb[19].mxu0  ;;  %v2126_v24 = vadd.f32 %v2120_v38, %v3124_v60  ;;  %v2263_v60 = vld [vmem:[#allocation12 + $0x5] ss:$0 sm:$0xff] }
 0xf01   :  { %2130 = vadd.xlane.f32.xlu0 %v2126_v24  ;;  %v2127_v33 = vadd.f32 %v2123_v23, %v3126_v61 }
 0xf03   :  { %2132 = vadd.xlane.f32.xlu1 %v2127_v33 }
 0xf8e   :  { %v2131_v42 = vpop.xlane.xlu0 %2130 }
 0xf8f   :  { %v2134_v43 = vmul.f32 0.0078125, %v2131_v42 }
 0xf90   :  { %v2133_v44 = vpop.xlane.xlu1 %2132 }
 0xf91   :  { %v2136_v45 = vsub.f32 %v2126_v24, %v2134_v43  ;;  %v2135_v46 = vmul.f32 0.0078125, %v2133_v44 }
 0xf93   :  { %v2137_v47 = vsub.f32 %v2127_v33, %v2135_v46  ;;  %v2138_v48 = vmul.f32 %v2136_v45, %v2136_v45 }
 0xf95   :  { %2140 = vadd.xlane.f32.xlu0 %v2138_v48  ;;  %v2139_v49 = vmul.f32 %v2137_v47, %v2137_v47 }
 0xf97   :  { %2142 = vadd.xlane.f32.xlu1 %v2139_v49 }
0x1022   :  { %v2141_v50 = vpop.xlane.xlu0 %2140 }
0x1023   :  { %v2144_v51 = vmul.f32 0.0078125, %v2141_v50 }
0x1024   :  { %v2143_v52 = vpop.xlane.xlu1 %2142 }
0x1025   :  { %v2146_v53 = vadd.f32 1e-05, %v2144_v51  ;;  %v2145_v54 = vmul.f32 0.0078125, %v2143_v52 }
0x1027   :  { %2606 = vrsqrt.f32 %v2146_v53  ;;  %v2147_v55 = vadd.f32 1e-05, %v2145_v54 }
0x1029   :  { %2608 = vrsqrt.f32 %v2147_v55 }
0x1031   :  { %v2607_v56 = vpop.eup %2606 }
0x1032   :  { %v2150_v58 = vmul.f32 %v2607_v56, %v2136_v45 }
0x1033   :  { %v2609_v59 = vpop.eup %2608 }
0x1034   :  { %v2151_v61 = vmul.f32 %v2609_v59, %v2137_v47  ;;  %v2156_v62 = vmul.f32 %v2262_v57, %v2150_v58 }
0x1036   :  { %v2157_v63 = vmul.f32 %v2262_v57, %v2151_v61  ;;  %v2162_v0 = vadd.f32 %v2263_v60, %v2156_v62 }
0x1038   :  { %v2163_v2 = vadd.f32 %v2263_v60, %v2157_v63  ;;  %2164 = vst [vmem:[#allocation14] sm:$0xff] %v2162_v0 }
0x103a   :  { %2165 = vst [vmem:[#allocation14 + $0x8] sm:$0xff] %v2163_v2 }
0x103b   :  { %2753 = shalt.err (!%p2750_p10)
}
0x103c   :  { %s2754_s28 = scalar_lea.hbm %s3160_s6, 256 }
0x103d   :  { %p2755_p11 = scmp.ne.s32.totalorder %s3160_s6, %s2754_s28  ;;  %p2758_p12 = scmp.lt.u32.totalorder %s2754_s28, %s3160_s6 }
0x103f   :  { %p2760_p13 = pnand %p2758_p12, %p2755_p11 }
0x1041   :  { %2763 = shalt.err (!%p2760_p13)
}
0x1042   :  { %2177 = dma.vmem_to_hbm [thread:$0]  %s2172_s0, 256, %s3160_s6, [#allocation5], %s2781_s3, %s2781_s3, %s2782_s10  }
0x1043   :  { %2772 = dma.done.wait [#allocation5], 256  }
0x1044   :  { %2773 = vsyncadd [#allocation5], 4294967040 }
0x1045   :  { %2181 = vsyncpa [#allocation4], 1 }
0x1046   :  { %2182 = vsyncpa [#allocation7], 1 }
0x1047   :  { %2183 = vsyncpa [#allocation10], 1 }
0x1048   :  { %2184 = vsyncpa [#allocation13], 1 }
0x1049   :  { %2185 = vsyncpa [#allocation5], 1 }

</bundles_post_ra>
